<compile_context>
chip_gen: v5e
topology: v5e:2x2
jax: 0.10.0
libtpu: 0.0.40
codegen_flags: <defaults>
</compile_context>

<pallas_src>
import math
import functools

import jax
import jax.numpy as jnp
from jax.experimental import pallas as pl
from jax.experimental.pallas import tpu as pltpu  # noqa: F401  (TPU backend assumed)


_LN_EPS = 1e-6
_NEG_INF = -1e9


# ----------------------------- in-kernel math helpers -----------------------------

def _erf(x):
    # Abramowitz & Stegun 7.1.26 rational approximation (|err| < 1.5e-7, f32-level).
    # Matches torch's exact erf GELU to f32 precision without relying on a lax.erf
    # lowering inside Mosaic.
    p = 0.3275911
    a1, a2, a3, a4, a5 = 0.254829592, -0.284496736, 1.421413741, -1.453152027, 1.061405429
    sgn = jnp.where(x >= 0.0, jnp.float32(1.0), jnp.float32(-1.0))
    ax = jnp.abs(x)
    t = 1.0 / (1.0 + p * ax)
    poly = ((((a5 * t + a4) * t + a3) * t + a2) * t + a1) * t
    return sgn * (1.0 - poly * jnp.exp(-ax * ax))


def _gelu_exact(x):
    # torch F.gelu default (exact, erf-based)
    return 0.5 * x * (1.0 + _erf(x * (1.0 / math.sqrt(2.0))))


def _layer_norm(y, g, b):
    mu = jnp.mean(y, axis=-1, keepdims=True)
    var = jnp.mean(jnp.square(y - mu), axis=-1, keepdims=True)
    return (y - mu) * jax.lax.rsqrt(var + _LN_EPS) * g + b


def _decoder_layer(x_q, x_kv, mask_bias, wA_ref, fc_w_ref, ffn_w2_ref, vec_ref,
                   *, n_head, d_k, d_v, d_model, d_ff):
    """Post-LN MHA + post-LN FFN over batch-folded rows (dropout = identity)."""
    qk_w = n_head * d_k
    kv_w = n_head * (d_k + d_v)

    # Lane-dense weight slab [Wq | Wk | Wv | FFN_W1]; static lane slices.
    w_q = wA_ref[:, 0:qk_w]
    w_kv = wA_ref[:, qk_w:qk_w + kv_w]
    w_1 = wA_ref[:, qk_w + kv_w:qk_w + kv_w + d_ff]

    # Stacked bias / LayerNorm vectors (one small 2-D input per layer).
    fc_b = vec_ref[0:1, :d_model]
    ln_g = vec_ref[1:2, :d_model]
    ln_b = vec_ref[2:3, :d_model]
    ffn_b1 = vec_ref[3:4, :d_ff]
    ffn_b2 = vec_ref[4:5, :d_model]
    f_ln_g = vec_ref[5:6, :d_model]
    f_ln_b = vec_ref[6:7, :d_model]

    inv_temp = 1.0 / math.sqrt(d_k)
    # Q and fused K|V projections: one MXU push each over the whole folded batch.
    q_full = jnp.dot(x_q, w_q, preferred_element_type=jnp.float32) * inv_temp
    kv_full = jnp.dot(x_kv, w_kv, preferred_element_type=jnp.float32)
    k_full = kv_full[:, :n_head * d_k]
    v_full = kv_full[:, n_head * d_k:]

    heads = []
    for h in range(n_head):                 # unrolled; independent MXU pushes
        q = q_full[:, h * d_k:(h + 1) * d_k]
        k = k_full[:, h * d_k:(h + 1) * d_k]
        v = v_full[:, h * d_v:(h + 1) * d_v]
        s = jax.lax.dot_general(q, k, (((1,), (1,)), ((), ())),
                                preferred_element_type=jnp.float32)
        s = s + mask_bias                   # additive 0 / -1e9 (block-diag batch [+ causal])
        s = s - jnp.max(s, axis=-1, keepdims=True)
        e = jnp.exp(s)
        attn = e * pl.reciprocal(jnp.sum(e, axis=-1, keepdims=True), approx=True)
        heads.append(jnp.dot(attn, v, preferred_element_type=jnp.float32))

    # Lane-concat head outputs -> ONE fc matmul (no serial per-head accumulation).
    o = jnp.concatenate(heads, axis=-1)     # (rows, n_head*d_v)
    y = jnp.dot(o, fc_w_ref[...], preferred_element_type=jnp.float32) + (x_q + fc_b)
    y = _layer_norm(y, ln_g, ln_b)

    # PositionwiseFeedForward (post-LN): LN(w2(gelu(w1(y))) + y)
    h1 = jnp.dot(y, w_1, preferred_element_type=jnp.float32) + ffn_b1
    h1 = _gelu_exact(h1)
    y2 = jnp.dot(h1, ffn_w2_ref[...], preferred_element_type=jnp.float32) + ffn_b2 + y
    return _layer_norm(y2, f_ln_g, f_ln_b)


# ----------------------------- fused decoder kernel -----------------------------

def _decoder_kernel(emb_in_ref, emb_w_ref, emb_const_ref, refer_ref,
                    mask0_ref, mask1_ref,
                    l0_wA_ref, l0_fc_ref, l0_w2_ref, l0_vec_ref,
                    l1_wA_ref, l1_fc_ref, l1_w2_ref, l1_vec_ref,
                    o_ref, *, n_head, d_k, d_v, d_model, d_ff, batch, l_dec, l_ref):
    cfg = dict(n_head=n_head, d_k=d_k, d_v=d_v, d_model=d_model, d_ff=d_ff)

    # ---- DataEmbedding: one fused matmul + one precomputed additive constant ----
    # emb_in = [x_{t-1} | x_t | x_{t+1} | x_mark], emb_w = [Wprev; Wmid; Wnext; Wtime],
    # emb_const = PE + conv_b + time_b (tiled over batch), all packed host-side.
    dec = (jnp.dot(emb_in_ref[...], emb_w_ref[...], preferred_element_type=jnp.float32)
           + emb_const_ref[...])
    refer = refer_ref[...].astype(jnp.float32)          # (batch*l_ref, d_model)
    # TODO(synk): nn.Dropout (embedding / attention / fc / FFN) is identity at inference.

    # ---- layer 0: Q = dec_emb, K = V = refer (no user mask); batch handled by the
    # block-diagonal additive bias (cross-batch scores underflow to exactly 0). ----
    dec = _decoder_layer(dec, refer, mask0_ref[...],
                         l0_wA_ref, l0_fc_ref, l0_w2_ref, l0_vec_ref, **cfg)

    # ---- layer 1: K/V = per-batch concat([refer_b, dec_b]) built in VMEM
    # (sublane-aligned slices), causal+block-diag additive mask. ----
    parts = []
    for b in range(batch):
        parts.append(refer[b * l_ref:(b + 1) * l_ref, :])
        parts.append(dec[b * l_dec:(b + 1) * l_dec, :])
    kv = jnp.concatenate(parts, axis=0)                  # (batch*(l_ref+l_dec), d_model)
    dec = _decoder_layer(dec, kv, mask1_ref[...],
                         l1_wA_ref, l1_fc_ref, l1_w2_ref, l1_vec_ref, **cfg)

    o_ref[...] = dec.astype(o_ref.dtype)


# ----------------------------- host-side packing / wrapper -----------------------------

def sinusoidal_pe(L, d_model):
    pos = jnp.arange(L, dtype=jnp.float32)[:, None]
    div = jnp.exp(jnp.arange(0, d_model, 2, dtype=jnp.float32)
                  * (-math.log(10000.0) / d_model))
    pe = jnp.zeros((L, d_model), jnp.float32)
    pe = pe.at[:, 0::2].set(jnp.sin(pos * div))
    pe = pe.at[:, 1::2].set(jnp.cos(pos * div))
    return pe


def _pack_layer(lp, d_model, d_ff):
    # Lane-dense slab of all d_model-row matrices + one stacked vector array.
    wA = jnp.concatenate([lp["w_qs"], lp["w_ks"], lp["w_vs"], lp["ffn_w1"]], axis=-1)
    vw = max(d_model, d_ff)

    def pad(v):
        return jnp.pad(v, ((0, 0), (0, vw - v.shape[-1])))

    vec = jnp.concatenate(
        [pad(lp["fc_b"]), pad(lp["ln_g"]), pad(lp["ln_b"]),
         pad(lp["ffn_b1"]), pad(lp["ffn_b2"]),
         pad(lp["ffn_ln_g"]), pad(lp["ffn_ln_b"]),
         jnp.zeros((1, vw), jnp.float32)], axis=0)        # (8, max(d_model, d_ff))
    return wA, lp["fc_w"], lp["ffn_w2"], vec


def decoder_forward(params, x_dec, x_mark_dec, refer, mask, *, n_head, d_k, d_v):
    """Pyraformer Decoder forward, fully fused into a single Pallas invocation."""
    B, Ld, c_in = x_dec.shape
    d_mark = x_mark_dec.shape[-1]
    Lr, d_model = refer.shape[1], refer.shape[2]
    d_ff = params["layer0"]["ffn_w1"].shape[-1]

    ep = params["embed"]
    # Circular Conv1d(k=3) taps gathered host-side (tiny rolls on the raw input) and
    # lane-concatenated with the time marks -> ONE embedding matmul in-kernel.
    # conv_w rows are ordered [W_{t-1}; W_t; W_{t+1}]  (PyTorch Conv1d(k=3, padding=1,
    # padding_mode='circular') tap order; porting torch weights needs the matching permute).
    x_prev = jnp.roll(x_dec, 1, axis=1)
    x_next = jnp.roll(x_dec, -1, axis=1)
    emb_in = jnp.concatenate([x_prev, x_dec, x_next, x_mark_dec], axis=-1)
    emb_in = emb_in.reshape(B * Ld, 3 * c_in + d_mark).astype(jnp.float32)
    emb_w = jnp.concatenate([ep["conv_w"], ep["time_w"]], axis=0)
    emb_const = jnp.tile(sinusoidal_pe(Ld, d_model) + ep["conv_b"] + ep["time_b"], (B, 1))

    refer_flat = refer.reshape(B * Lr, d_model).astype(jnp.float32)

    # Additive attention biases (0 / -1e9), precomputed host-side:
    #   block-diagonal over the folded batch; layer 1 additionally carries the
    #   user (causal) mask inside the diagonal blocks.  Semantics identical to
    #   masked_fill(mask, -1e9): masked scores underflow to 0 after softmax.
    neg = jnp.float32(_NEG_INF)
    bq = jnp.repeat(jnp.arange(B), Ld)[:, None]
    bk0 = jnp.repeat(jnp.arange(B), Lr)[None, :]
    mask0 = jnp.where(bq == bk0, jnp.float32(0.0), neg)           # (B*Ld, B*Lr)
    lkv1 = Lr + Ld
    bk1 = jnp.repeat(jnp.arange(B), lkv1)[None, :]
    inner1 = jnp.where(mask != 0, neg, jnp.float32(0.0))          # (Ld, Lr+Ld)
    mask1 = jnp.where(bq == bk1, jnp.tile(inner1, (B, B)), neg)   # (B*Ld, B*(Lr+Ld))

    l0 = _pack_layer(params["layer0"], d_model, d_ff)
    l1 = _pack_layer(params["layer1"], d_model, d_ff)

    kern = functools.partial(_decoder_kernel, n_head=n_head, d_k=d_k, d_v=d_v,
                             d_model=d_model, d_ff=d_ff, batch=B, l_dec=Ld, l_ref=Lr)
    # Single grid step, whole arrays VMEM-resident (no grid, no per-step overhead).
    out = pl.pallas_call(
        kern,
        out_shape=jax.ShapeDtypeStruct((B * Ld, d_model), jnp.float32),
    )(emb_in, emb_w, emb_const, refer_flat, mask0, mask1, *l0, *l1)
    return out.reshape(B, Ld, d_model)


# ----------------------------- parameter init -----------------------------

def init_params(key, enc_in, d_mark, d_model, d_ff, n_head, d_k, d_v):
    keys = jax.random.split(key, 3)

    def nrm(k, shape, scale=0.05):
        return scale * jax.random.normal(k, shape, jnp.float32)

    def make_layer(k):
        ks = jax.random.split(k, 9)
        return dict(
            w_qs=nrm(ks[0], (d_model, n_head * d_k)),        # bias=False
            w_ks=nrm(ks[1], (d_model, n_head * d_k)),        # bias=False
            w_vs=nrm(ks[2], (d_model, n_head * d_v)),        # bias=False
            fc_w=nrm(ks[3], (n_head * d_v, d_model)),
            fc_b=nrm(ks[4], (1, d_model)),
            ln_g=jnp.ones((1, d_model), jnp.float32),
            ln_b=jnp.zeros((1, d_model), jnp.float32),
            ffn_w1=nrm(ks[5], (d_model, d_ff)),
            ffn_b1=nrm(ks[6], (1, d_ff)),
            ffn_w2=nrm(ks[7], (d_ff, d_model)),
            ffn_b2=nrm(ks[8], (1, d_model)),
            ffn_ln_g=jnp.ones((1, d_model), jnp.float32),
            ffn_ln_b=jnp.zeros((1, d_model), jnp.float32),
        )

    ke = jax.random.split(keys[0], 4)
    embed = dict(
        conv_w=nrm(ke[0], (3 * enc_in, d_model)),   # Conv1d(c_in, d_model, k=3, circular), flattened
        conv_b=nrm(ke[1], (1, d_model)),
        time_w=nrm(ke[2], (d_mark, d_model)),       # TimeFeatureEmbedding linear
        time_b=nrm(ke[3], (1, d_model)),
    )
    # Static config (n_head, d_k, d_v) is passed as Python ints via functools.partial.
    return dict(embed=embed, layer0=make_layer(keys[1]), layer1=make_layer(keys[2]))


# ----------------------------- main -----------------------------

if __name__ == "__main__":
    # opt: d_model=32, d_ff=64, n_heads=4, factor(d_k=d_v)=8, enc_in=4, dropout=0.1
    B, L_dec, L_ref = 2, 8, 16
    enc_in, d_mark, d_model, d_ff, n_head, factor = 4, 4, 32, 64, 4, 8

    key = jax.random.PRNGKey(0)
    kp, kx, km, kr = jax.random.split(key, 4)

    params = init_params(kp, enc_in, d_mark, d_model, d_ff, n_head, factor, factor)

    x_dec = jax.random.normal(kx, (B, L_dec, enc_in), jnp.float32)
    x_mark_dec = jax.random.normal(km, (B, L_dec, d_mark), jnp.float32)
    refer = jax.random.normal(kr, (B, L_ref, d_model), jnp.float32)

    # decoder self-attn mask (nonzero = masked): refer part fully visible,
    # decoder part causal; shape (L_dec, L_ref + L_dec), same for every batch
    # (PyTorch repeats it over batch — identical semantics).
    dec_causal = jnp.triu(jnp.ones((L_dec, L_dec), jnp.int32), k=1)
    mask = jnp.concatenate([jnp.zeros((L_dec, L_ref), jnp.int32), dec_causal], axis=1)

    fwd = jax.jit(functools.partial(decoder_forward,
                                    n_head=n_head, d_k=factor, d_v=factor))
    out = fwd(params, x_dec, x_mark_dec, refer, mask)
    out = jax.block_until_ready(out)

    assert out.shape == (B, L_dec, d_model)
    assert bool(jnp.all(jnp.isfinite(out)))
    print("KERNEL_OK")
</pallas_src>

<mosaic_0001>
module attributes {stable_mosaic.version = 11 : i64} {
  func.func @_decoder_kernel(%arg0: memref<16x16xf32, #tpu.memory_space<vmem>>, %arg1: memref<16x32xf32, #tpu.memory_space<vmem>>, %arg2: memref<16x32xf32, #tpu.memory_space<vmem>>, %arg3: memref<32x32xf32, #tpu.memory_space<vmem>>, %arg4: memref<16x32xf32, #tpu.memory_space<vmem>>, %arg5: memref<16x48xf32, #tpu.memory_space<vmem>>, %arg6: memref<32x160xf32, #tpu.memory_space<vmem>>, %arg7: memref<32x32xf32, #tpu.memory_space<vmem>>, %arg8: memref<64x32xf32, #tpu.memory_space<vmem>>, %arg9: memref<8x64xf32, #tpu.memory_space<vmem>>, %arg10: memref<32x160xf32, #tpu.memory_space<vmem>>, %arg11: memref<32x32xf32, #tpu.memory_space<vmem>>, %arg12: memref<64x32xf32, #tpu.memory_space<vmem>>, %arg13: memref<8x64xf32, #tpu.memory_space<vmem>>, %arg14: memref<16x32xf32, #tpu.memory_space<vmem>>) attributes {dimension_semantics = [], scalar_prefetch = 0 : i64, scratch_operands = 0 : i64, tpu.core_type = #tpu.core_type<tc>} {
    %c0 = arith.constant 0 : index
    %c0_0 = arith.constant 0 : index
    %0 = vector.load %arg0[%c0, %c0_0] : memref<16x16xf32, #tpu.memory_space<vmem>>, vector<16x16xf32>
    %c0_1 = arith.constant 0 : index
    %c0_2 = arith.constant 0 : index
    %1 = vector.load %arg1[%c0_1, %c0_2] : memref<16x32xf32, #tpu.memory_space<vmem>>, vector<16x32xf32>
    %cst = arith.constant dense<0.000000e+00> : vector<16x32xf32>
    %2 = tpu.matmul %0, %1, %cst {dimension_numbers = #tpu.dot_dimension_numbers<[1], [0], [0], [1], [0, 0, 1, 1], [], []>} : vector<16x16xf32>, vector<16x32xf32>, vector<16x32xf32> -> vector<16x32xf32>
    %c0_3 = arith.constant 0 : index
    %c0_4 = arith.constant 0 : index
    %3 = vector.load %arg2[%c0_3, %c0_4] : memref<16x32xf32, #tpu.memory_space<vmem>>, vector<16x32xf32>
    %4 = arith.addf %2, %3 : vector<16x32xf32>
    %c0_5 = arith.constant 0 : index
    %c0_6 = arith.constant 0 : index
    %5 = vector.load %arg3[%c0_5, %c0_6] : memref<32x32xf32, #tpu.memory_space<vmem>>, vector<32x32xf32>
    %c0_7 = arith.constant 0 : index
    %c0_8 = arith.constant 0 : index
    %6 = vector.load %arg4[%c0_7, %c0_8] : memref<16x32xf32, #tpu.memory_space<vmem>>, vector<16x32xf32>
    %c0_9 = arith.constant 0 : index
    %c0_10 = arith.constant 0 : index
    %7 = vector.load %arg6[%c0_9, %c0_10] : memref<32x160xf32, #tpu.memory_space<vmem>>, vector<32x32xf32>
    %c0_11 = arith.constant 0 : index
    %c32 = arith.constant 32 : index
    %8 = vector.load %arg6[%c0_11, %c32] : memref<32x160xf32, #tpu.memory_space<vmem>>, vector<32x64xf32>
    %c0_12 = arith.constant 0 : index
    %c96 = arith.constant 96 : index
    %9 = vector.load %arg6[%c0_12, %c96] : memref<32x160xf32, #tpu.memory_space<vmem>>, vector<32x64xf32>
    %c0_13 = arith.constant 0 : index
    %c0_14 = arith.constant 0 : index
    %10 = vector.load %arg9[%c0_13, %c0_14] : memref<8x64xf32, #tpu.memory_space<vmem>>, vector<1x32xf32>
    %c1 = arith.constant 1 : index
    %c0_15 = arith.constant 0 : index
    %11 = vector.load %arg9[%c1, %c0_15] : memref<8x64xf32, #tpu.memory_space<vmem>>, vector<1x32xf32>
    %c2 = arith.constant 2 : index
    %c0_16 = arith.constant 0 : index
    %12 = vector.load %arg9[%c2, %c0_16] : memref<8x64xf32, #tpu.memory_space<vmem>>, vector<1x32xf32>
    %c3 = arith.constant 3 : index
    %c0_17 = arith.constant 0 : index
    %13 = vector.load %arg9[%c3, %c0_17] : memref<8x64xf32, #tpu.memory_space<vmem>>, vector<1x64xf32>
    %c4 = arith.constant 4 : index
    %c0_18 = arith.constant 0 : index
    %14 = vector.load %arg9[%c4, %c0_18] : memref<8x64xf32, #tpu.memory_space<vmem>>, vector<1x32xf32>
    %c5 = arith.constant 5 : index
    %c0_19 = arith.constant 0 : index
    %15 = vector.load %arg9[%c5, %c0_19] : memref<8x64xf32, #tpu.memory_space<vmem>>, vector<1x32xf32>
    %c6 = arith.constant 6 : index
    %c0_20 = arith.constant 0 : index
    %16 = vector.load %arg9[%c6, %c0_20] : memref<8x64xf32, #tpu.memory_space<vmem>>, vector<1x32xf32>
    %cst_21 = arith.constant dense<0.000000e+00> : vector<16x32xf32>
    %17 = tpu.matmul %4, %7, %cst_21 {dimension_numbers = #tpu.dot_dimension_numbers<[1], [0], [0], [1], [0, 0, 1, 1], [], []>} : vector<16x32xf32>, vector<32x32xf32>, vector<16x32xf32> -> vector<16x32xf32>
    %cst_22 = arith.constant 0.353553385 : f32
    %18 = vector.broadcast %cst_22 : f32 to vector<16x32xf32>
    %19 = arith.mulf %17, %18 : vector<16x32xf32>
    %cst_23 = arith.constant dense<0.000000e+00> : vector<32x64xf32>
    %20 = tpu.matmul %5, %8, %cst_23 {dimension_numbers = #tpu.dot_dimension_numbers<[1], [0], [0], [1], [0, 0, 1, 1], [], []>} : vector<32x32xf32>, vector<32x64xf32>, vector<32x64xf32> -> vector<32x64xf32>
    %21 = vector.extract_strided_slice %20 {offsets = [0, 0], sizes = [32, 32], strides = [1, 1]} : vector<32x64xf32> to vector<32x32xf32>
    %22 = vector.extract_strided_slice %20 {offsets = [0, 32], sizes = [32, 32], strides = [1, 1]} : vector<32x64xf32> to vector<32x32xf32>
    %23 = vector.extract_strided_slice %19 {offsets = [0, 0], sizes = [16, 8], strides = [1, 1]} : vector<16x32xf32> to vector<16x8xf32>
    %24 = vector.extract_strided_slice %21 {offsets = [0, 0], sizes = [32, 8], strides = [1, 1]} : vector<32x32xf32> to vector<32x8xf32>
    %25 = vector.extract_strided_slice %22 {offsets = [0, 0], sizes = [32, 8], strides = [1, 1]} : vector<32x32xf32> to vector<32x8xf32>
    %cst_24 = arith.constant dense<0.000000e+00> : vector<16x32xf32>
    %26 = tpu.matmul %23, %24, %cst_24 {dimension_numbers = #tpu.dot_dimension_numbers<[1], [1], [0], [0], [0, 0, 1, 0], [], []>} : vector<16x8xf32>, vector<32x8xf32>, vector<16x32xf32> -> vector<16x32xf32>
    %27 = arith.addf %26, %6 : vector<16x32xf32>
    %cst_25 = arith.constant dense<0xFF800000> : vector<16xf32>
    %28 = vector.multi_reduction <maximumf>, %27, %cst_25 [1] : vector<16x32xf32> to vector<16xf32>
    %29 = vector.shape_cast %28 : vector<16xf32> to vector<16x1xf32>
    %30 = vector.broadcast %29 : vector<16x1xf32> to vector<16x32xf32>
    %31 = arith.subf %27, %30 : vector<16x32xf32>
    %32 = math.exp %31 : vector<16x32xf32>
    %cst_26 = arith.constant dense<0.000000e+00> : vector<16xf32>
    %33 = vector.multi_reduction <add>, %32, %cst_26 [1] : vector<16x32xf32> to vector<16xf32>
    %34 = vector.shape_cast %33 : vector<16xf32> to vector<16x1xf32>
    %35 = tpu.reciprocal %34 {approx = true} : vector<16x1xf32> -> vector<16x1xf32>
    %36 = vector.broadcast %35 : vector<16x1xf32> to vector<16x32xf32>
    %37 = arith.mulf %32, %36 : vector<16x32xf32>
    %cst_27 = arith.constant dense<0.000000e+00> : vector<16x8xf32>
    %38 = tpu.matmul %37, %25, %cst_27 {dimension_numbers = #tpu.dot_dimension_numbers<[1], [0], [0], [1], [0, 0, 1, 1], [], []>} : vector<16x32xf32>, vector<32x8xf32>, vector<16x8xf32> -> vector<16x8xf32>
    %39 = vector.extract_strided_slice %19 {offsets = [0, 8], sizes = [16, 8], strides = [1, 1]} : vector<16x32xf32> to vector<16x8xf32>
    %40 = vector.extract_strided_slice %21 {offsets = [0, 8], sizes = [32, 8], strides = [1, 1]} : vector<32x32xf32> to vector<32x8xf32>
    %41 = vector.extract_strided_slice %22 {offsets = [0, 8], sizes = [32, 8], strides = [1, 1]} : vector<32x32xf32> to vector<32x8xf32>
    %cst_28 = arith.constant dense<0.000000e+00> : vector<16x32xf32>
    %42 = tpu.matmul %39, %40, %cst_28 {dimension_numbers = #tpu.dot_dimension_numbers<[1], [1], [0], [0], [0, 0, 1, 0], [], []>} : vector<16x8xf32>, vector<32x8xf32>, vector<16x32xf32> -> vector<16x32xf32>
    %43 = arith.addf %42, %6 : vector<16x32xf32>
    %cst_29 = arith.constant dense<0xFF800000> : vector<16xf32>
    %44 = vector.multi_reduction <maximumf>, %43, %cst_29 [1] : vector<16x32xf32> to vector<16xf32>
    %45 = vector.shape_cast %44 : vector<16xf32> to vector<16x1xf32>
    %46 = vector.broadcast %45 : vector<16x1xf32> to vector<16x32xf32>
    %47 = arith.subf %43, %46 : vector<16x32xf32>
    %48 = math.exp %47 : vector<16x32xf32>
    %cst_30 = arith.constant dense<0.000000e+00> : vector<16xf32>
    %49 = vector.multi_reduction <add>, %48, %cst_30 [1] : vector<16x32xf32> to vector<16xf32>
    %50 = vector.shape_cast %49 : vector<16xf32> to vector<16x1xf32>
    %51 = tpu.reciprocal %50 {approx = true} : vector<16x1xf32> -> vector<16x1xf32>
    %52 = vector.broadcast %51 : vector<16x1xf32> to vector<16x32xf32>
    %53 = arith.mulf %48, %52 : vector<16x32xf32>
    %cst_31 = arith.constant dense<0.000000e+00> : vector<16x8xf32>
    %54 = tpu.matmul %53, %41, %cst_31 {dimension_numbers = #tpu.dot_dimension_numbers<[1], [0], [0], [1], [0, 0, 1, 1], [], []>} : vector<16x32xf32>, vector<32x8xf32>, vector<16x8xf32> -> vector<16x8xf32>
    %55 = vector.extract_strided_slice %19 {offsets = [0, 16], sizes = [16, 8], strides = [1, 1]} : vector<16x32xf32> to vector<16x8xf32>
    %56 = vector.extract_strided_slice %21 {offsets = [0, 16], sizes = [32, 8], strides = [1, 1]} : vector<32x32xf32> to vector<32x8xf32>
    %57 = vector.extract_strided_slice %22 {offsets = [0, 16], sizes = [32, 8], strides = [1, 1]} : vector<32x32xf32> to vector<32x8xf32>
    %cst_32 = arith.constant dense<0.000000e+00> : vector<16x32xf32>
    %58 = tpu.matmul %55, %56, %cst_32 {dimension_numbers = #tpu.dot_dimension_numbers<[1], [1], [0], [0], [0, 0, 1, 0], [], []>} : vector<16x8xf32>, vector<32x8xf32>, vector<16x32xf32> -> vector<16x32xf32>
    %59 = arith.addf %58, %6 : vector<16x32xf32>
    %cst_33 = arith.constant dense<0xFF800000> : vector<16xf32>
    %60 = vector.multi_reduction <maximumf>, %59, %cst_33 [1] : vector<16x32xf32> to vector<16xf32>
    %61 = vector.shape_cast %60 : vector<16xf32> to vector<16x1xf32>
    %62 = vector.broadcast %61 : vector<16x1xf32> to vector<16x32xf32>
    %63 = arith.subf %59, %62 : vector<16x32xf32>
    %64 = math.exp %63 : vector<16x32xf32>
    %cst_34 = arith.constant dense<0.000000e+00> : vector<16xf32>
    %65 = vector.multi_reduction <add>, %64, %cst_34 [1] : vector<16x32xf32> to vector<16xf32>
    %66 = vector.shape_cast %65 : vector<16xf32> to vector<16x1xf32>
    %67 = tpu.reciprocal %66 {approx = true} : vector<16x1xf32> -> vector<16x1xf32>
    %68 = vector.broadcast %67 : vector<16x1xf32> to vector<16x32xf32>
    %69 = arith.mulf %64, %68 : vector<16x32xf32>
    %cst_35 = arith.constant dense<0.000000e+00> : vector<16x8xf32>
    %70 = tpu.matmul %69, %57, %cst_35 {dimension_numbers = #tpu.dot_dimension_numbers<[1], [0], [0], [1], [0, 0, 1, 1], [], []>} : vector<16x32xf32>, vector<32x8xf32>, vector<16x8xf32> -> vector<16x8xf32>
    %71 = vector.extract_strided_slice %19 {offsets = [0, 24], sizes = [16, 8], strides = [1, 1]} : vector<16x32xf32> to vector<16x8xf32>
    %72 = vector.extract_strided_slice %21 {offsets = [0, 24], sizes = [32, 8], strides = [1, 1]} : vector<32x32xf32> to vector<32x8xf32>
    %73 = vector.extract_strided_slice %22 {offsets = [0, 24], sizes = [32, 8], strides = [1, 1]} : vector<32x32xf32> to vector<32x8xf32>
    %cst_36 = arith.constant dense<0.000000e+00> : vector<16x32xf32>
    %74 = tpu.matmul %71, %72, %cst_36 {dimension_numbers = #tpu.dot_dimension_numbers<[1], [1], [0], [0], [0, 0, 1, 0], [], []>} : vector<16x8xf32>, vector<32x8xf32>, vector<16x32xf32> -> vector<16x32xf32>
    %75 = arith.addf %74, %6 : vector<16x32xf32>
    %cst_37 = arith.constant dense<0xFF800000> : vector<16xf32>
    %76 = vector.multi_reduction <maximumf>, %75, %cst_37 [1] : vector<16x32xf32> to vector<16xf32>
    %77 = vector.shape_cast %76 : vector<16xf32> to vector<16x1xf32>
    %78 = vector.broadcast %77 : vector<16x1xf32> to vector<16x32xf32>
    %79 = arith.subf %75, %78 : vector<16x32xf32>
    %80 = math.exp %79 : vector<16x32xf32>
    %cst_38 = arith.constant dense<0.000000e+00> : vector<16xf32>
    %81 = vector.multi_reduction <add>, %80, %cst_38 [1] : vector<16x32xf32> to vector<16xf32>
    %82 = vector.shape_cast %81 : vector<16xf32> to vector<16x1xf32>
    %83 = tpu.reciprocal %82 {approx = true} : vector<16x1xf32> -> vector<16x1xf32>
    %84 = vector.broadcast %83 : vector<16x1xf32> to vector<16x32xf32>
    %85 = arith.mulf %80, %84 : vector<16x32xf32>
    %cst_39 = arith.constant dense<0.000000e+00> : vector<16x8xf32>
    %86 = tpu.matmul %85, %73, %cst_39 {dimension_numbers = #tpu.dot_dimension_numbers<[1], [0], [0], [1], [0, 0, 1, 1], [], []>} : vector<16x32xf32>, vector<32x8xf32>, vector<16x8xf32> -> vector<16x8xf32>
    %87 = tpu.concatenate %38, %54, %70, %86 in 1 : vector<16x8xf32>, vector<16x8xf32>, vector<16x8xf32>, vector<16x8xf32> -> vector<16x32xf32>
    %c0_40 = arith.constant 0 : index
    %c0_41 = arith.constant 0 : index
    %88 = vector.load %arg7[%c0_40, %c0_41] : memref<32x32xf32, #tpu.memory_space<vmem>>, vector<32x32xf32>
    %cst_42 = arith.constant dense<0.000000e+00> : vector<16x32xf32>
    %89 = tpu.matmul %87, %88, %cst_42 {dimension_numbers = #tpu.dot_dimension_numbers<[1], [0], [0], [1], [0, 0, 1, 1], [], []>} : vector<16x32xf32>, vector<32x32xf32>, vector<16x32xf32> -> vector<16x32xf32>
    %90 = vector.broadcast %10 : vector<1x32xf32> to vector<16x32xf32>
    %91 = arith.addf %4, %90 : vector<16x32xf32>
    %92 = arith.addf %89, %91 : vector<16x32xf32>
    %cst_43 = arith.constant dense<0.000000e+00> : vector<16xf32>
    %93 = vector.multi_reduction <add>, %92, %cst_43 [1] : vector<16x32xf32> to vector<16xf32>
    %94 = vector.shape_cast %93 : vector<16xf32> to vector<16x1xf32>
    %cst_44 = arith.constant 3.200000e+01 : f32
    %95 = vector.broadcast %cst_44 : f32 to vector<16x1xf32>
    %96 = arith.divf %94, %95 : vector<16x1xf32>
    %97 = vector.broadcast %96 : vector<16x1xf32> to vector<16x32xf32>
    %98 = arith.subf %92, %97 : vector<16x32xf32>
    %99 = arith.mulf %98, %98 : vector<16x32xf32>
    %cst_45 = arith.constant dense<0.000000e+00> : vector<16xf32>
    %100 = vector.multi_reduction <add>, %99, %cst_45 [1] : vector<16x32xf32> to vector<16xf32>
    %101 = vector.shape_cast %100 : vector<16xf32> to vector<16x1xf32>
    %cst_46 = arith.constant 3.200000e+01 : f32
    %102 = vector.broadcast %cst_46 : f32 to vector<16x1xf32>
    %103 = arith.divf %101, %102 : vector<16x1xf32>
    %104 = vector.broadcast %96 : vector<16x1xf32> to vector<16x32xf32>
    %105 = arith.subf %92, %104 : vector<16x32xf32>
    %cst_47 = arith.constant 9.99999997E-7 : f32
    %106 = vector.broadcast %cst_47 : f32 to vector<16x1xf32>
    %107 = arith.addf %103, %106 : vector<16x1xf32>
    %108 = math.rsqrt %107 : vector<16x1xf32>
    %109 = vector.broadcast %108 : vector<16x1xf32> to vector<16x32xf32>
    %110 = arith.mulf %105, %109 : vector<16x32xf32>
    %111 = vector.broadcast %11 : vector<1x32xf32> to vector<16x32xf32>
    %112 = arith.mulf %110, %111 : vector<16x32xf32>
    %113 = vector.broadcast %12 : vector<1x32xf32> to vector<16x32xf32>
    %114 = arith.addf %112, %113 : vector<16x32xf32>
    %cst_48 = arith.constant dense<0.000000e+00> : vector<16x64xf32>
    %115 = tpu.matmul %114, %9, %cst_48 {dimension_numbers = #tpu.dot_dimension_numbers<[1], [0], [0], [1], [0, 0, 1, 1], [], []>} : vector<16x32xf32>, vector<32x64xf32>, vector<16x64xf32> -> vector<16x64xf32>
    %116 = vector.broadcast %13 : vector<1x64xf32> to vector<16x64xf32>
    %117 = arith.addf %115, %116 : vector<16x64xf32>
    %cst_49 = arith.constant 5.000000e-01 : f32
    %118 = vector.broadcast %cst_49 : f32 to vector<16x64xf32>
    %119 = arith.mulf %118, %117 : vector<16x64xf32>
    %cst_50 = arith.constant 0.707106769 : f32
    %120 = vector.broadcast %cst_50 : f32 to vector<16x64xf32>
    %121 = arith.mulf %117, %120 : vector<16x64xf32>
    %cst_51 = arith.constant 0.000000e+00 : f32
    %122 = vector.broadcast %cst_51 : f32 to vector<16x64xf32>
    %123 = arith.cmpf oge, %121, %122 : vector<16x64xf32>
    %cst_52 = arith.constant 1.000000e+00 : f32
    %cst_53 = arith.constant -1.000000e+00 : f32
    %124 = vector.broadcast %cst_52 : f32 to vector<16x64xf32>
    %125 = vector.broadcast %cst_53 : f32 to vector<16x64xf32>
    %126 = arith.select %123, %124, %125 : vector<16x64xi1>, vector<16x64xf32>
    %127 = math.absf %121 : vector<16x64xf32>
    %cst_54 = arith.constant 0.327591091 : f32
    %128 = vector.broadcast %cst_54 : f32 to vector<16x64xf32>
    %129 = arith.mulf %128, %127 : vector<16x64xf32>
    %cst_55 = arith.constant 1.000000e+00 : f32
    %130 = vector.broadcast %cst_55 : f32 to vector<16x64xf32>
    %131 = arith.addf %130, %129 : vector<16x64xf32>
    %cst_56 = arith.constant 1.000000e+00 : f32
    %132 = vector.broadcast %cst_56 : f32 to vector<16x64xf32>
    %133 = arith.divf %132, %131 : vector<16x64xf32>
    %cst_57 = arith.constant 1.06140542 : f32
    %134 = vector.broadcast %cst_57 : f32 to vector<16x64xf32>
    %135 = arith.mulf %134, %133 : vector<16x64xf32>
    %cst_58 = arith.constant -1.45315206 : f32
    %136 = vector.broadcast %cst_58 : f32 to vector<16x64xf32>
    %137 = arith.addf %135, %136 : vector<16x64xf32>
    %138 = arith.mulf %137, %133 : vector<16x64xf32>
    %cst_59 = arith.constant 1.42141378 : f32
    %139 = vector.broadcast %cst_59 : f32 to vector<16x64xf32>
    %140 = arith.addf %138, %139 : vector<16x64xf32>
    %141 = arith.mulf %140, %133 : vector<16x64xf32>
    %cst_60 = arith.constant -0.284496725 : f32
    %142 = vector.broadcast %cst_60 : f32 to vector<16x64xf32>
    %143 = arith.addf %141, %142 : vector<16x64xf32>
    %144 = arith.mulf %143, %133 : vector<16x64xf32>
    %cst_61 = arith.constant 0.254829586 : f32
    %145 = vector.broadcast %cst_61 : f32 to vector<16x64xf32>
    %146 = arith.addf %144, %145 : vector<16x64xf32>
    %147 = arith.mulf %146, %133 : vector<16x64xf32>
    %cst_62 = arith.constant 0.000000e+00 : f32
    %148 = vector.broadcast %cst_62 : f32 to vector<16x64xf32>
    %149 = arith.subf %148, %127 : vector<16x64xf32>
    %150 = arith.mulf %149, %127 : vector<16x64xf32>
    %151 = math.exp %150 : vector<16x64xf32>
    %152 = arith.mulf %147, %151 : vector<16x64xf32>
    %cst_63 = arith.constant 1.000000e+00 : f32
    %153 = vector.broadcast %cst_63 : f32 to vector<16x64xf32>
    %154 = arith.subf %153, %152 : vector<16x64xf32>
    %155 = arith.mulf %126, %154 : vector<16x64xf32>
    %cst_64 = arith.constant 1.000000e+00 : f32
    %156 = vector.broadcast %cst_64 : f32 to vector<16x64xf32>
    %157 = arith.addf %156, %155 : vector<16x64xf32>
    %158 = arith.mulf %119, %157 : vector<16x64xf32>
    %c0_65 = arith.constant 0 : index
    %c0_66 = arith.constant 0 : index
    %159 = vector.load %arg8[%c0_65, %c0_66] : memref<64x32xf32, #tpu.memory_space<vmem>>, vector<64x32xf32>
    %cst_67 = arith.constant dense<0.000000e+00> : vector<16x32xf32>
    %160 = tpu.matmul %158, %159, %cst_67 {dimension_numbers = #tpu.dot_dimension_numbers<[1], [0], [0], [1], [0, 0, 1, 1], [], []>} : vector<16x64xf32>, vector<64x32xf32>, vector<16x32xf32> -> vector<16x32xf32>
    %161 = vector.broadcast %14 : vector<1x32xf32> to vector<16x32xf32>
    %162 = arith.addf %160, %161 : vector<16x32xf32>
    %163 = arith.addf %162, %114 : vector<16x32xf32>
    %cst_68 = arith.constant dense<0.000000e+00> : vector<16xf32>
    %164 = vector.multi_reduction <add>, %163, %cst_68 [1] : vector<16x32xf32> to vector<16xf32>
    %165 = vector.shape_cast %164 : vector<16xf32> to vector<16x1xf32>
    %cst_69 = arith.constant 3.200000e+01 : f32
    %166 = vector.broadcast %cst_69 : f32 to vector<16x1xf32>
    %167 = arith.divf %165, %166 : vector<16x1xf32>
    %168 = vector.broadcast %167 : vector<16x1xf32> to vector<16x32xf32>
    %169 = arith.subf %163, %168 : vector<16x32xf32>
    %170 = arith.mulf %169, %169 : vector<16x32xf32>
    %cst_70 = arith.constant dense<0.000000e+00> : vector<16xf32>
    %171 = vector.multi_reduction <add>, %170, %cst_70 [1] : vector<16x32xf32> to vector<16xf32>
    %172 = vector.shape_cast %171 : vector<16xf32> to vector<16x1xf32>
    %cst_71 = arith.constant 3.200000e+01 : f32
    %173 = vector.broadcast %cst_71 : f32 to vector<16x1xf32>
    %174 = arith.divf %172, %173 : vector<16x1xf32>
    %175 = vector.broadcast %167 : vector<16x1xf32> to vector<16x32xf32>
    %176 = arith.subf %163, %175 : vector<16x32xf32>
    %cst_72 = arith.constant 9.99999997E-7 : f32
    %177 = vector.broadcast %cst_72 : f32 to vector<16x1xf32>
    %178 = arith.addf %174, %177 : vector<16x1xf32>
    %179 = math.rsqrt %178 : vector<16x1xf32>
    %180 = vector.broadcast %179 : vector<16x1xf32> to vector<16x32xf32>
    %181 = arith.mulf %176, %180 : vector<16x32xf32>
    %182 = vector.broadcast %15 : vector<1x32xf32> to vector<16x32xf32>
    %183 = arith.mulf %181, %182 : vector<16x32xf32>
    %184 = vector.broadcast %16 : vector<1x32xf32> to vector<16x32xf32>
    %185 = arith.addf %183, %184 : vector<16x32xf32>
    %186 = vector.extract_strided_slice %5 {offsets = [0, 0], sizes = [16, 32], strides = [1, 1]} : vector<32x32xf32> to vector<16x32xf32>
    %187 = vector.extract_strided_slice %185 {offsets = [0, 0], sizes = [8, 32], strides = [1, 1]} : vector<16x32xf32> to vector<8x32xf32>
    %188 = vector.extract_strided_slice %5 {offsets = [16, 0], sizes = [16, 32], strides = [1, 1]} : vector<32x32xf32> to vector<16x32xf32>
    %189 = vector.extract_strided_slice %185 {offsets = [8, 0], sizes = [8, 32], strides = [1, 1]} : vector<16x32xf32> to vector<8x32xf32>
    %190 = tpu.concatenate %186, %187, %188, %189 in 0 : vector<16x32xf32>, vector<8x32xf32>, vector<16x32xf32>, vector<8x32xf32> -> vector<48x32xf32>
    %c0_73 = arith.constant 0 : index
    %c0_74 = arith.constant 0 : index
    %191 = vector.load %arg5[%c0_73, %c0_74] : memref<16x48xf32, #tpu.memory_space<vmem>>, vector<16x48xf32>
    %c0_75 = arith.constant 0 : index
    %c0_76 = arith.constant 0 : index
    %192 = vector.load %arg10[%c0_75, %c0_76] : memref<32x160xf32, #tpu.memory_space<vmem>>, vector<32x32xf32>
    %c0_77 = arith.constant 0 : index
    %c32_78 = arith.constant 32 : index
    %193 = vector.load %arg10[%c0_77, %c32_78] : memref<32x160xf32, #tpu.memory_space<vmem>>, vector<32x64xf32>
    %c0_79 = arith.constant 0 : index
    %c96_80 = arith.constant 96 : index
    %194 = vector.load %arg10[%c0_79, %c96_80] : memref<32x160xf32, #tpu.memory_space<vmem>>, vector<32x64xf32>
    %c0_81 = arith.constant 0 : index
    %c0_82 = arith.constant 0 : index
    %195 = vector.load %arg13[%c0_81, %c0_82] : memref<8x64xf32, #tpu.memory_space<vmem>>, vector<1x32xf32>
    %c1_83 = arith.constant 1 : index
    %c0_84 = arith.constant 0 : index
    %196 = vector.load %arg13[%c1_83, %c0_84] : memref<8x64xf32, #tpu.memory_space<vmem>>, vector<1x32xf32>
    %c2_85 = arith.constant 2 : index
    %c0_86 = arith.constant 0 : index
    %197 = vector.load %arg13[%c2_85, %c0_86] : memref<8x64xf32, #tpu.memory_space<vmem>>, vector<1x32xf32>
    %c3_87 = arith.constant 3 : index
    %c0_88 = arith.constant 0 : index
    %198 = vector.load %arg13[%c3_87, %c0_88] : memref<8x64xf32, #tpu.memory_space<vmem>>, vector<1x64xf32>
    %c4_89 = arith.constant 4 : index
    %c0_90 = arith.constant 0 : index
    %199 = vector.load %arg13[%c4_89, %c0_90] : memref<8x64xf32, #tpu.memory_space<vmem>>, vector<1x32xf32>
    %c5_91 = arith.constant 5 : index
    %c0_92 = arith.constant 0 : index
    %200 = vector.load %arg13[%c5_91, %c0_92] : memref<8x64xf32, #tpu.memory_space<vmem>>, vector<1x32xf32>
    %c6_93 = arith.constant 6 : index
    %c0_94 = arith.constant 0 : index
    %201 = vector.load %arg13[%c6_93, %c0_94] : memref<8x64xf32, #tpu.memory_space<vmem>>, vector<1x32xf32>
    %cst_95 = arith.constant dense<0.000000e+00> : vector<16x32xf32>
    %202 = tpu.matmul %185, %192, %cst_95 {dimension_numbers = #tpu.dot_dimension_numbers<[1], [0], [0], [1], [0, 0, 1, 1], [], []>} : vector<16x32xf32>, vector<32x32xf32>, vector<16x32xf32> -> vector<16x32xf32>
    %cst_96 = arith.constant 0.353553385 : f32
    %203 = vector.broadcast %cst_96 : f32 to vector<16x32xf32>
    %204 = arith.mulf %202, %203 : vector<16x32xf32>
    %cst_97 = arith.constant dense<0.000000e+00> : vector<48x64xf32>
    %205 = tpu.matmul %190, %193, %cst_97 {dimension_numbers = #tpu.dot_dimension_numbers<[1], [0], [0], [1], [0, 0, 1, 1], [], []>} : vector<48x32xf32>, vector<32x64xf32>, vector<48x64xf32> -> vector<48x64xf32>
    %206 = vector.extract_strided_slice %205 {offsets = [0, 0], sizes = [48, 32], strides = [1, 1]} : vector<48x64xf32> to vector<48x32xf32>
    %207 = vector.extract_strided_slice %205 {offsets = [0, 32], sizes = [48, 32], strides = [1, 1]} : vector<48x64xf32> to vector<48x32xf32>
    %208 = vector.extract_strided_slice %204 {offsets = [0, 0], sizes = [16, 8], strides = [1, 1]} : vector<16x32xf32> to vector<16x8xf32>
    %209 = vector.extract_strided_slice %206 {offsets = [0, 0], sizes = [48, 8], strides = [1, 1]} : vector<48x32xf32> to vector<48x8xf32>
    %210 = vector.extract_strided_slice %207 {offsets = [0, 0], sizes = [48, 8], strides = [1, 1]} : vector<48x32xf32> to vector<48x8xf32>
    %cst_98 = arith.constant dense<0.000000e+00> : vector<16x48xf32>
    %211 = tpu.matmul %208, %209, %cst_98 {dimension_numbers = #tpu.dot_dimension_numbers<[1], [1], [0], [0], [0, 0, 1, 0], [], []>} : vector<16x8xf32>, vector<48x8xf32>, vector<16x48xf32> -> vector<16x48xf32>
    %212 = arith.addf %211, %191 : vector<16x48xf32>
    %cst_99 = arith.constant dense<0xFF800000> : vector<16xf32>
    %213 = vector.multi_reduction <maximumf>, %212, %cst_99 [1] : vector<16x48xf32> to vector<16xf32>
    %214 = vector.shape_cast %213 : vector<16xf32> to vector<16x1xf32>
    %215 = vector.broadcast %214 : vector<16x1xf32> to vector<16x48xf32>
    %216 = arith.subf %212, %215 : vector<16x48xf32>
    %217 = math.exp %216 : vector<16x48xf32>
    %cst_100 = arith.constant dense<0.000000e+00> : vector<16xf32>
    %218 = vector.multi_reduction <add>, %217, %cst_100 [1] : vector<16x48xf32> to vector<16xf32>
    %219 = vector.shape_cast %218 : vector<16xf32> to vector<16x1xf32>
    %220 = tpu.reciprocal %219 {approx = true} : vector<16x1xf32> -> vector<16x1xf32>
    %221 = vector.broadcast %220 : vector<16x1xf32> to vector<16x48xf32>
    %222 = arith.mulf %217, %221 : vector<16x48xf32>
    %cst_101 = arith.constant dense<0.000000e+00> : vector<16x8xf32>
    %223 = tpu.matmul %222, %210, %cst_101 {dimension_numbers = #tpu.dot_dimension_numbers<[1], [0], [0], [1], [0, 0, 1, 1], [], []>} : vector<16x48xf32>, vector<48x8xf32>, vector<16x8xf32> -> vector<16x8xf32>
    %224 = vector.extract_strided_slice %204 {offsets = [0, 8], sizes = [16, 8], strides = [1, 1]} : vector<16x32xf32> to vector<16x8xf32>
    %225 = vector.extract_strided_slice %206 {offsets = [0, 8], sizes = [48, 8], strides = [1, 1]} : vector<48x32xf32> to vector<48x8xf32>
    %226 = vector.extract_strided_slice %207 {offsets = [0, 8], sizes = [48, 8], strides = [1, 1]} : vector<48x32xf32> to vector<48x8xf32>
    %cst_102 = arith.constant dense<0.000000e+00> : vector<16x48xf32>
    %227 = tpu.matmul %224, %225, %cst_102 {dimension_numbers = #tpu.dot_dimension_numbers<[1], [1], [0], [0], [0, 0, 1, 0], [], []>} : vector<16x8xf32>, vector<48x8xf32>, vector<16x48xf32> -> vector<16x48xf32>
    %228 = arith.addf %227, %191 : vector<16x48xf32>
    %cst_103 = arith.constant dense<0xFF800000> : vector<16xf32>
    %229 = vector.multi_reduction <maximumf>, %228, %cst_103 [1] : vector<16x48xf32> to vector<16xf32>
    %230 = vector.shape_cast %229 : vector<16xf32> to vector<16x1xf32>
    %231 = vector.broadcast %230 : vector<16x1xf32> to vector<16x48xf32>
    %232 = arith.subf %228, %231 : vector<16x48xf32>
    %233 = math.exp %232 : vector<16x48xf32>
    %cst_104 = arith.constant dense<0.000000e+00> : vector<16xf32>
    %234 = vector.multi_reduction <add>, %233, %cst_104 [1] : vector<16x48xf32> to vector<16xf32>
    %235 = vector.shape_cast %234 : vector<16xf32> to vector<16x1xf32>
    %236 = tpu.reciprocal %235 {approx = true} : vector<16x1xf32> -> vector<16x1xf32>
    %237 = vector.broadcast %236 : vector<16x1xf32> to vector<16x48xf32>
    %238 = arith.mulf %233, %237 : vector<16x48xf32>
    %cst_105 = arith.constant dense<0.000000e+00> : vector<16x8xf32>
    %239 = tpu.matmul %238, %226, %cst_105 {dimension_numbers = #tpu.dot_dimension_numbers<[1], [0], [0], [1], [0, 0, 1, 1], [], []>} : vector<16x48xf32>, vector<48x8xf32>, vector<16x8xf32> -> vector<16x8xf32>
    %240 = vector.extract_strided_slice %204 {offsets = [0, 16], sizes = [16, 8], strides = [1, 1]} : vector<16x32xf32> to vector<16x8xf32>
    %241 = vector.extract_strided_slice %206 {offsets = [0, 16], sizes = [48, 8], strides = [1, 1]} : vector<48x32xf32> to vector<48x8xf32>
    %242 = vector.extract_strided_slice %207 {offsets = [0, 16], sizes = [48, 8], strides = [1, 1]} : vector<48x32xf32> to vector<48x8xf32>
    %cst_106 = arith.constant dense<0.000000e+00> : vector<16x48xf32>
    %243 = tpu.matmul %240, %241, %cst_106 {dimension_numbers = #tpu.dot_dimension_numbers<[1], [1], [0], [0], [0, 0, 1, 0], [], []>} : vector<16x8xf32>, vector<48x8xf32>, vector<16x48xf32> -> vector<16x48xf32>
    %244 = arith.addf %243, %191 : vector<16x48xf32>
    %cst_107 = arith.constant dense<0xFF800000> : vector<16xf32>
    %245 = vector.multi_reduction <maximumf>, %244, %cst_107 [1] : vector<16x48xf32> to vector<16xf32>
    %246 = vector.shape_cast %245 : vector<16xf32> to vector<16x1xf32>
    %247 = vector.broadcast %246 : vector<16x1xf32> to vector<16x48xf32>
    %248 = arith.subf %244, %247 : vector<16x48xf32>
    %249 = math.exp %248 : vector<16x48xf32>
    %cst_108 = arith.constant dense<0.000000e+00> : vector<16xf32>
    %250 = vector.multi_reduction <add>, %249, %cst_108 [1] : vector<16x48xf32> to vector<16xf32>
    %251 = vector.shape_cast %250 : vector<16xf32> to vector<16x1xf32>
    %252 = tpu.reciprocal %251 {approx = true} : vector<16x1xf32> -> vector<16x1xf32>
    %253 = vector.broadcast %252 : vector<16x1xf32> to vector<16x48xf32>
    %254 = arith.mulf %249, %253 : vector<16x48xf32>
    %cst_109 = arith.constant dense<0.000000e+00> : vector<16x8xf32>
    %255 = tpu.matmul %254, %242, %cst_109 {dimension_numbers = #tpu.dot_dimension_numbers<[1], [0], [0], [1], [0, 0, 1, 1], [], []>} : vector<16x48xf32>, vector<48x8xf32>, vector<16x8xf32> -> vector<16x8xf32>
    %256 = vector.extract_strided_slice %204 {offsets = [0, 24], sizes = [16, 8], strides = [1, 1]} : vector<16x32xf32> to vector<16x8xf32>
    %257 = vector.extract_strided_slice %206 {offsets = [0, 24], sizes = [48, 8], strides = [1, 1]} : vector<48x32xf32> to vector<48x8xf32>
    %258 = vector.extract_strided_slice %207 {offsets = [0, 24], sizes = [48, 8], strides = [1, 1]} : vector<48x32xf32> to vector<48x8xf32>
    %cst_110 = arith.constant dense<0.000000e+00> : vector<16x48xf32>
    %259 = tpu.matmul %256, %257, %cst_110 {dimension_numbers = #tpu.dot_dimension_numbers<[1], [1], [0], [0], [0, 0, 1, 0], [], []>} : vector<16x8xf32>, vector<48x8xf32>, vector<16x48xf32> -> vector<16x48xf32>
    %260 = arith.addf %259, %191 : vector<16x48xf32>
    %cst_111 = arith.constant dense<0xFF800000> : vector<16xf32>
    %261 = vector.multi_reduction <maximumf>, %260, %cst_111 [1] : vector<16x48xf32> to vector<16xf32>
    %262 = vector.shape_cast %261 : vector<16xf32> to vector<16x1xf32>
    %263 = vector.broadcast %262 : vector<16x1xf32> to vector<16x48xf32>
    %264 = arith.subf %260, %263 : vector<16x48xf32>
    %265 = math.exp %264 : vector<16x48xf32>
    %cst_112 = arith.constant dense<0.000000e+00> : vector<16xf32>
    %266 = vector.multi_reduction <add>, %265, %cst_112 [1] : vector<16x48xf32> to vector<16xf32>
    %267 = vector.shape_cast %266 : vector<16xf32> to vector<16x1xf32>
    %268 = tpu.reciprocal %267 {approx = true} : vector<16x1xf32> -> vector<16x1xf32>
    %269 = vector.broadcast %268 : vector<16x1xf32> to vector<16x48xf32>
    %270 = arith.mulf %265, %269 : vector<16x48xf32>
    %cst_113 = arith.constant dense<0.000000e+00> : vector<16x8xf32>
    %271 = tpu.matmul %270, %258, %cst_113 {dimension_numbers = #tpu.dot_dimension_numbers<[1], [0], [0], [1], [0, 0, 1, 1], [], []>} : vector<16x48xf32>, vector<48x8xf32>, vector<16x8xf32> -> vector<16x8xf32>
    %272 = tpu.concatenate %223, %239, %255, %271 in 1 : vector<16x8xf32>, vector<16x8xf32>, vector<16x8xf32>, vector<16x8xf32> -> vector<16x32xf32>
    %c0_114 = arith.constant 0 : index
    %c0_115 = arith.constant 0 : index
    %273 = vector.load %arg11[%c0_114, %c0_115] : memref<32x32xf32, #tpu.memory_space<vmem>>, vector<32x32xf32>
    %cst_116 = arith.constant dense<0.000000e+00> : vector<16x32xf32>
    %274 = tpu.matmul %272, %273, %cst_116 {dimension_numbers = #tpu.dot_dimension_numbers<[1], [0], [0], [1], [0, 0, 1, 1], [], []>} : vector<16x32xf32>, vector<32x32xf32>, vector<16x32xf32> -> vector<16x32xf32>
    %275 = vector.broadcast %195 : vector<1x32xf32> to vector<16x32xf32>
    %276 = arith.addf %185, %275 : vector<16x32xf32>
    %277 = arith.addf %274, %276 : vector<16x32xf32>
    %cst_117 = arith.constant dense<0.000000e+00> : vector<16xf32>
    %278 = vector.multi_reduction <add>, %277, %cst_117 [1] : vector<16x32xf32> to vector<16xf32>
    %279 = vector.shape_cast %278 : vector<16xf32> to vector<16x1xf32>
    %cst_118 = arith.constant 3.200000e+01 : f32
    %280 = vector.broadcast %cst_118 : f32 to vector<16x1xf32>
    %281 = arith.divf %279, %280 : vector<16x1xf32>
    %282 = vector.broadcast %281 : vector<16x1xf32> to vector<16x32xf32>
    %283 = arith.subf %277, %282 : vector<16x32xf32>
    %284 = arith.mulf %283, %283 : vector<16x32xf32>
    %cst_119 = arith.constant dense<0.000000e+00> : vector<16xf32>
    %285 = vector.multi_reduction <add>, %284, %cst_119 [1] : vector<16x32xf32> to vector<16xf32>
    %286 = vector.shape_cast %285 : vector<16xf32> to vector<16x1xf32>
    %cst_120 = arith.constant 3.200000e+01 : f32
    %287 = vector.broadcast %cst_120 : f32 to vector<16x1xf32>
    %288 = arith.divf %286, %287 : vector<16x1xf32>
    %289 = vector.broadcast %281 : vector<16x1xf32> to vector<16x32xf32>
    %290 = arith.subf %277, %289 : vector<16x32xf32>
    %cst_121 = arith.constant 9.99999997E-7 : f32
    %291 = vector.broadcast %cst_121 : f32 to vector<16x1xf32>
    %292 = arith.addf %288, %291 : vector<16x1xf32>
    %293 = math.rsqrt %292 : vector<16x1xf32>
    %294 = vector.broadcast %293 : vector<16x1xf32> to vector<16x32xf32>
    %295 = arith.mulf %290, %294 : vector<16x32xf32>
    %296 = vector.broadcast %196 : vector<1x32xf32> to vector<16x32xf32>
    %297 = arith.mulf %295, %296 : vector<16x32xf32>
    %298 = vector.broadcast %197 : vector<1x32xf32> to vector<16x32xf32>
    %299 = arith.addf %297, %298 : vector<16x32xf32>
    %cst_122 = arith.constant dense<0.000000e+00> : vector<16x64xf32>
    %300 = tpu.matmul %299, %194, %cst_122 {dimension_numbers = #tpu.dot_dimension_numbers<[1], [0], [0], [1], [0, 0, 1, 1], [], []>} : vector<16x32xf32>, vector<32x64xf32>, vector<16x64xf32> -> vector<16x64xf32>
    %301 = vector.broadcast %198 : vector<1x64xf32> to vector<16x64xf32>
    %302 = arith.addf %300, %301 : vector<16x64xf32>
    %cst_123 = arith.constant 5.000000e-01 : f32
    %303 = vector.broadcast %cst_123 : f32 to vector<16x64xf32>
    %304 = arith.mulf %303, %302 : vector<16x64xf32>
    %cst_124 = arith.constant 0.707106769 : f32
    %305 = vector.broadcast %cst_124 : f32 to vector<16x64xf32>
    %306 = arith.mulf %302, %305 : vector<16x64xf32>
    %cst_125 = arith.constant 0.000000e+00 : f32
    %307 = vector.broadcast %cst_125 : f32 to vector<16x64xf32>
    %308 = arith.cmpf oge, %306, %307 : vector<16x64xf32>
    %cst_126 = arith.constant 1.000000e+00 : f32
    %cst_127 = arith.constant -1.000000e+00 : f32
    %309 = vector.broadcast %cst_126 : f32 to vector<16x64xf32>
    %310 = vector.broadcast %cst_127 : f32 to vector<16x64xf32>
    %311 = arith.select %308, %309, %310 : vector<16x64xi1>, vector<16x64xf32>
    %312 = math.absf %306 : vector<16x64xf32>
    %cst_128 = arith.constant 0.327591091 : f32
    %313 = vector.broadcast %cst_128 : f32 to vector<16x64xf32>
    %314 = arith.mulf %313, %312 : vector<16x64xf32>
    %cst_129 = arith.constant 1.000000e+00 : f32
    %315 = vector.broadcast %cst_129 : f32 to vector<16x64xf32>
    %316 = arith.addf %315, %314 : vector<16x64xf32>
    %cst_130 = arith.constant 1.000000e+00 : f32
    %317 = vector.broadcast %cst_130 : f32 to vector<16x64xf32>
    %318 = arith.divf %317, %316 : vector<16x64xf32>
    %cst_131 = arith.constant 1.06140542 : f32
    %319 = vector.broadcast %cst_131 : f32 to vector<16x64xf32>
    %320 = arith.mulf %319, %318 : vector<16x64xf32>
    %cst_132 = arith.constant -1.45315206 : f32
    %321 = vector.broadcast %cst_132 : f32 to vector<16x64xf32>
    %322 = arith.addf %320, %321 : vector<16x64xf32>
    %323 = arith.mulf %322, %318 : vector<16x64xf32>
    %cst_133 = arith.constant 1.42141378 : f32
    %324 = vector.broadcast %cst_133 : f32 to vector<16x64xf32>
    %325 = arith.addf %323, %324 : vector<16x64xf32>
    %326 = arith.mulf %325, %318 : vector<16x64xf32>
    %cst_134 = arith.constant -0.284496725 : f32
    %327 = vector.broadcast %cst_134 : f32 to vector<16x64xf32>
    %328 = arith.addf %326, %327 : vector<16x64xf32>
    %329 = arith.mulf %328, %318 : vector<16x64xf32>
    %cst_135 = arith.constant 0.254829586 : f32
    %330 = vector.broadcast %cst_135 : f32 to vector<16x64xf32>
    %331 = arith.addf %329, %330 : vector<16x64xf32>
    %332 = arith.mulf %331, %318 : vector<16x64xf32>
    %cst_136 = arith.constant 0.000000e+00 : f32
    %333 = vector.broadcast %cst_136 : f32 to vector<16x64xf32>
    %334 = arith.subf %333, %312 : vector<16x64xf32>
    %335 = arith.mulf %334, %312 : vector<16x64xf32>
    %336 = math.exp %335 : vector<16x64xf32>
    %337 = arith.mulf %332, %336 : vector<16x64xf32>
    %cst_137 = arith.constant 1.000000e+00 : f32
    %338 = vector.broadcast %cst_137 : f32 to vector<16x64xf32>
    %339 = arith.subf %338, %337 : vector<16x64xf32>
    %340 = arith.mulf %311, %339 : vector<16x64xf32>
    %cst_138 = arith.constant 1.000000e+00 : f32
    %341 = vector.broadcast %cst_138 : f32 to vector<16x64xf32>
    %342 = arith.addf %341, %340 : vector<16x64xf32>
    %343 = arith.mulf %304, %342 : vector<16x64xf32>
    %c0_139 = arith.constant 0 : index
    %c0_140 = arith.constant 0 : index
    %344 = vector.load %arg12[%c0_139, %c0_140] : memref<64x32xf32, #tpu.memory_space<vmem>>, vector<64x32xf32>
    %cst_141 = arith.constant dense<0.000000e+00> : vector<16x32xf32>
    %345 = tpu.matmul %343, %344, %cst_141 {dimension_numbers = #tpu.dot_dimension_numbers<[1], [0], [0], [1], [0, 0, 1, 1], [], []>} : vector<16x64xf32>, vector<64x32xf32>, vector<16x32xf32> -> vector<16x32xf32>
    %346 = vector.broadcast %199 : vector<1x32xf32> to vector<16x32xf32>
    %347 = arith.addf %345, %346 : vector<16x32xf32>
    %348 = arith.addf %347, %299 : vector<16x32xf32>
    %cst_142 = arith.constant dense<0.000000e+00> : vector<16xf32>
    %349 = vector.multi_reduction <add>, %348, %cst_142 [1] : vector<16x32xf32> to vector<16xf32>
    %350 = vector.shape_cast %349 : vector<16xf32> to vector<16x1xf32>
    %cst_143 = arith.constant 3.200000e+01 : f32
    %351 = vector.broadcast %cst_143 : f32 to vector<16x1xf32>
    %352 = arith.divf %350, %351 : vector<16x1xf32>
    %353 = vector.broadcast %352 : vector<16x1xf32> to vector<16x32xf32>
    %354 = arith.subf %348, %353 : vector<16x32xf32>
    %355 = arith.mulf %354, %354 : vector<16x32xf32>
    %cst_144 = arith.constant dense<0.000000e+00> : vector<16xf32>
    %356 = vector.multi_reduction <add>, %355, %cst_144 [1] : vector<16x32xf32> to vector<16xf32>
    %357 = vector.shape_cast %356 : vector<16xf32> to vector<16x1xf32>
    %cst_145 = arith.constant 3.200000e+01 : f32
    %358 = vector.broadcast %cst_145 : f32 to vector<16x1xf32>
    %359 = arith.divf %357, %358 : vector<16x1xf32>
    %360 = vector.broadcast %352 : vector<16x1xf32> to vector<16x32xf32>
    %361 = arith.subf %348, %360 : vector<16x32xf32>
    %cst_146 = arith.constant 9.99999997E-7 : f32
    %362 = vector.broadcast %cst_146 : f32 to vector<16x1xf32>
    %363 = arith.addf %359, %362 : vector<16x1xf32>
    %364 = math.rsqrt %363 : vector<16x1xf32>
    %365 = vector.broadcast %364 : vector<16x1xf32> to vector<16x32xf32>
    %366 = arith.mulf %361, %365 : vector<16x32xf32>
    %367 = vector.broadcast %200 : vector<1x32xf32> to vector<16x32xf32>
    %368 = arith.mulf %366, %367 : vector<16x32xf32>
    %369 = vector.broadcast %201 : vector<1x32xf32> to vector<16x32xf32>
    %370 = arith.addf %368, %369 : vector<16x32xf32>
    %c0_147 = arith.constant 0 : index
    %c0_148 = arith.constant 0 : index
    %371 = vector.load %arg14[%c0_147, %c0_148] : memref<16x32xf32, #tpu.memory_space<vmem>>, vector<16x32xf32>
    tpu.vector_store %arg14[%c0_147, %c0_148], %370 {strides = array<i32>} : memref<16x32xf32, #tpu.memory_space<vmem>>, vector<16x32xf32>,
    return
  }
}

</mosaic_0001>

<bundles_post_ra>
// kernel: eq.25
= control target key start
LH: loop header
LB: loop body
LE: loop exit
PB: predicated region body
PF: predicated region fallthrough
CT: control target
= control target key end

     0   :  { %vm7_vm0 = vcmask 195584   ;;  %vm13_vm1 = vcmask 392384   ;;  %s39_s0 = inlined_call_operand.vmem [shape: s32[2,24], index: 0, kind: input, shape index: {}]   ;;  %s40_s1 = inlined_call_operand.vmem [shape: s32[48], index: 1, kind: output, shape index: {}]  }
   0x1   :  { %v4_v0 = vld [vmem:[%s39_s0] sm:$0x3]  ;;  %s22_s0 = smov 24  }
   0x2   :  { %5 = vst [vmem:[#allocation1] sm:$0x3] %v4_v0 }
   0x9   :  { %v10_v1 = vld [vmem:[#allocation1 + $0x1] sm:$0x1]   ;;  %v6_v2 = vld [vmem:[#allocation1] sm:$0x1]  }
   0xa   :  { %11 = vrot.lane.b32.xlu0 %v10_v1, %s22_s0  ;;  %8 = vst.msk [vmem:[#allocation0] sm:$0x1] %vm7_vm0, %v6_v2  }
  0x7c   :  { %v12_v3 = vpop.permute.xlu0 %11  }
  0x7d   :  { %14 = vst.msk [vmem:[#allocation0] sm:$0x1] %vm13_vm1, %v12_v3  }
  0x84   :  { %v17_v4 = vld [vmem:[#allocation0] sm:$0x1] }
  0x85   :  { %20 = vst [vmem:[%s40_s1] sm:$0x1] %v17_v4 }

// kernel: eq.18
= control target key start
LH: loop header
LB: loop body
LE: loop exit
PB: predicated region body
PF: predicated region fallthrough
CT: control target
= control target key end

     0   :  { %vm7_vm0 = vcmask 130048   ;;  %vm13_vm1 = vcmask 261248   ;;  %s39_s0 = inlined_call_operand.vmem [shape: s32[2,16], index: 0, kind: input, shape index: {}]   ;;  %s40_s1 = inlined_call_operand.vmem [shape: s32[32], index: 1, kind: output, shape index: {}]  }
   0x1   :  { %v4_v0 = vld [vmem:[%s39_s0] sm:$0x3]  ;;  %s22_s0 = smov 16  }
   0x2   :  { %5 = vst [vmem:[#allocation1] sm:$0x3] %v4_v0 }
   0x9   :  { %v10_v1 = vld [vmem:[#allocation1 + $0x1] sm:$0x1]   ;;  %v6_v2 = vld [vmem:[#allocation1] sm:$0x1]  }
   0xa   :  { %11 = vrot.lane.b32.xlu0 %v10_v1, %s22_s0  ;;  %8 = vst.msk [vmem:[#allocation0] sm:$0x1] %vm7_vm0, %v6_v2  }
  0x7c   :  { %v12_v3 = vpop.permute.xlu0 %11  }
  0x7d   :  { %14 = vst.msk [vmem:[#allocation0] sm:$0x1] %vm13_vm1, %v12_v3  }
  0x84   :  { %v17_v4 = vld [vmem:[#allocation0] sm:$0x1] }
  0x85   :  { %20 = vst [vmem:[%s40_s1] sm:$0x1] %v17_v4 }

// kernel: eq.15
= control target key start
LH: loop header
LB: loop body
LE: loop exit
PB: predicated region body
PF: predicated region fallthrough
CT: control target
= control target key end

     0   :  { %vm7_vm0 = vcmask 64512   ;;  %vm13_vm1 = vcmask 130112   ;;  %s39_s0 = inlined_call_operand.vmem [shape: s32[2,8], index: 0, kind: input, shape index: {}]   ;;  %s40_s1 = inlined_call_operand.vmem [shape: s32[16], index: 1, kind: output, shape index: {}]  }
   0x1   :  { %v4_v0 = vld [vmem:[%s39_s0] sm:$0x3]  ;;  %s22_s0 = smov 8  }
   0x2   :  { %5 = vst [vmem:[#allocation1] sm:$0x3] %v4_v0 }
   0x9   :  { %v10_v1 = vld [vmem:[#allocation1 + $0x1] sm:$0x1]   ;;  %v6_v2 = vld [vmem:[#allocation1] sm:$0x1]  }
   0xa   :  { %11 = vrot.lane.b32.xlu0 %v10_v1, %s22_s0  ;;  %8 = vst.msk [vmem:[#allocation0] sm:$0x1] %vm7_vm0, %v6_v2  }
  0x7c   :  { %v12_v3 = vpop.permute.xlu0 %11  }
  0x7d   :  { %14 = vst.msk [vmem:[#allocation0] sm:$0x1] %vm13_vm1, %v12_v3  }
  0x84   :  { %v17_v4 = vld [vmem:[#allocation0] sm:$0x1] }
  0x85   :  { %20 = vst [vmem:[%s40_s1] sm:$0x1] %v17_v4 }

// kernel: tile.18
= control target key start
LH: loop header
LB: loop body
LE: loop exit
PB: predicated region body
PF: predicated region fallthrough
CT: control target
= control target key end

     0   :  { %s154_s0 = inlined_call_operand.vmem [shape: f32[8,24], index: 0, kind: input, shape index: {}]   ;;  %s155_s1 = inlined_call_operand.vmem [shape: f32[2,8,2,24], index: 1, kind: output, shape index: {}]  }
   0x1   :  { %v4_v0 = vld [vmem:[%s154_s0] ss:$0 sm:$0xff]  ;;  %v51_v1 = vld [vmem:[%s154_s0 + $0x1] ss:$0 sm:$0xff]  ;;  %v54_v2 = vld [vmem:[%s154_s0 + $0x2] ss:$0 sm:$0xff] }
   0x2   :  { %5 = vst [vmem:[%s155_s1] sm:$0x3] %v4_v0  ;;  %v57_v3 = vld [vmem:[%s154_s0 + $0x3] ss:$0 sm:$0xff]  ;;  %v60_v4 = vld [vmem:[%s154_s0 + $0x4] ss:$0 sm:$0xff] }
   0x3   :  { %50 = vst [vmem:[%s155_s1 + $0x10] sm:$0x3] %v4_v0  ;;  %v63_v5 = vld [vmem:[%s154_s0 + $0x5] ss:$0 sm:$0xff]  ;;  %v66_v6 = vld [vmem:[%s154_s0 + $0x6] ss:$0 sm:$0xff] }
   0x4   :  { %52 = vst [vmem:[%s155_s1 + $0x2] sm:$0x3] %v51_v1  ;;  %v69_v7 = vld [vmem:[%s154_s0 + $0x7] ss:$0 sm:$0xff] }
   0x5   :  { %53 = vst [vmem:[%s155_s1 + $0x12] sm:$0x3] %v51_v1 }
   0x6   :  { %55 = vst [vmem:[%s155_s1 + $0x4] sm:$0x3] %v54_v2 }
   0x7   :  { %56 = vst [vmem:[%s155_s1 + $0x14] sm:$0x3] %v54_v2 }
   0x8   :  { %58 = vst [vmem:[%s155_s1 + $0x6] sm:$0x3] %v57_v3 }
   0x9   :  { %59 = vst [vmem:[%s155_s1 + $0x16] sm:$0x3] %v57_v3 }
   0xa   :  { %61 = vst [vmem:[%s155_s1 + $0x8] sm:$0x3] %v60_v4 }
   0xb   :  { %62 = vst [vmem:[%s155_s1 + $0x18] sm:$0x3] %v60_v4 }
   0xc   :  { %64 = vst [vmem:[%s155_s1 + $0xa] sm:$0x3] %v63_v5 }
   0xd   :  { %65 = vst [vmem:[%s155_s1 + $0x1a] sm:$0x3] %v63_v5 }
   0xe   :  { %67 = vst [vmem:[%s155_s1 + $0xc] sm:$0x3] %v66_v6 }
   0xf   :  { %68 = vst [vmem:[%s155_s1 + $0x1c] sm:$0x3] %v66_v6 }
  0x10   :  { %70 = vst [vmem:[%s155_s1 + $0xe] sm:$0x3] %v69_v7 }
  0x11   :  { %71 = vst [vmem:[%s155_s1 + $0x1e] sm:$0x3] %v69_v7 }

// kernel: tile.19
= control target key start
LH: loop header
LB: loop body
LE: loop exit
PB: predicated region body
PF: predicated region fallthrough
CT: control target
= control target key end

     0   :  { %vm68_vm0 = vcmask 1047556   ;;  %vm70_vm1 = vcmask 195584   ;;  %vm89_vm2 = vcmask 392384   ;;  %s195_s0 = inlined_call_operand.vmem [shape: f32[2,8,2,24], index: 0, kind: input, shape index: {}]   ;;  %s196_s1 = inlined_call_operand.vmem [shape: f32[16,48], index: 1, kind: output, shape index: {}]  }
   0x1   :  { %v110_v0 = vld [vmem:[%s195_s0 + $0xe] sm:$0x3]  ;;  %v111_v1 = vld [vmem:[%s195_s0 + $0xc] sm:$0x3]  ;;  %v112_v2 = vld [vmem:[%s195_s0 + $0xa] sm:$0x3] }
   0x2   :  { %39 = vst [vmem:[#allocation0 + $0x38] sm:$0x3] %v110_v0  ;;  %v113_v3 = vld [vmem:[%s195_s0 + $0x8] sm:$0x3]  ;;  %v114_v4 = vld [vmem:[%s195_s0 + $0x6] sm:$0x3] }
   0x3   :  { %43 = vst [vmem:[#allocation0 + $0x30] sm:$0x3] %v111_v1  ;;  %v115_v5 = vld [vmem:[%s195_s0 + $0x4] sm:$0x3]  ;;  %v116_v6 = vld [vmem:[%s195_s0 + $0x2] sm:$0x3] }
   0x4   :  { %47 = vst [vmem:[#allocation0 + $0x28] sm:$0x3] %v112_v2  ;;  %v64_v7 = vld [vmem:[%s195_s0] sm:$0x3]  ;;  %v102_v8 = vld [vmem:[%s195_s0 + $0x1e] sm:$0x3] }
   0x5   :  { %51 = vst [vmem:[#allocation0 + $0x20] sm:$0x3] %v113_v3  ;;  %v103_v9 = vld [vmem:[%s195_s0 + $0x1c] sm:$0x3]  ;;  %v104_v10 = vld [vmem:[%s195_s0 + $0x1a] sm:$0x3] }
   0x6   :  { %55 = vst [vmem:[#allocation0 + $0x18] sm:$0x3] %v114_v4  ;;  %v105_v11 = vld [vmem:[%s195_s0 + $0x18] sm:$0x3]  ;;  %v106_v12 = vld [vmem:[%s195_s0 + $0x16] sm:$0x3] }
   0x7   :  { %59 = vst [vmem:[#allocation0 + $0x10] sm:$0x3] %v115_v5  ;;  %v107_v13 = vld [vmem:[%s195_s0 + $0x14] sm:$0x3]  ;;  %v108_v14 = vld [vmem:[%s195_s0 + $0x12] sm:$0x3] }
   0x8   :  { %63 = vst [vmem:[#allocation0 + $0x8] sm:$0x3] %v116_v6  ;;  %v109_v15 = vld [vmem:[%s195_s0 + $0x10] sm:$0x3]  ;;  %s120_s0 = smov 24  }
   0x9   :  { %65 = vst [vmem:[#allocation0] sm:$0x3] %v64_v7 }
   0xa   :  { %7 = vst [vmem:[#allocation0 + $0x78] sm:$0x3] %v102_v8 }
   0xb   :  { %11 = vst [vmem:[#allocation0 + $0x70] sm:$0x3] %v103_v9 }
   0xc   :  { %15 = vst [vmem:[#allocation0 + $0x68] sm:$0x3] %v104_v10  ;;  %v84_v16 = vld [vmem:[#allocation0 + $0x1] ss:$8 sm:$0xf0]  }
   0xd   :  { %19 = vst [vmem:[#allocation0 + $0x60] sm:$0x3] %v105_v11  ;;  %v67_v23 = vld [vmem:[#allocation0] ss:$8 sm:$0xf0]  }
   0xe   :  { %23 = vst [vmem:[#allocation0 + $0x58] sm:$0x3] %v106_v12 }
   0xf   :  { %27 = vst [vmem:[#allocation0 + $0x50] sm:$0x3] %v107_v13 }
  0x10   :  { %v82_v17 = vld [vmem:[#allocation0 + $0x1] ss:$8 sm:$0xf]   ;;  %31 = vst [vmem:[#allocation0 + $0x48] sm:$0x3] %v108_v14 }
  0x11   :  { %v86_v18 = vsel %vm68_vm0, %v84_v16, %v82_v17  ;;  %35 = vst [vmem:[#allocation0 + $0x40] sm:$0x3] %v109_v15  ;;  %v66_v22 = vld [vmem:[#allocation0] ss:$8 sm:$0xf]  }
  0x12   :  { %87 = vrot.lane.b32.xlu0 %v86_v18, %s120_s0  ;;  %v69_v24 = vsel %vm68_vm0, %v67_v23, %v66_v22 }
  0x13   :  { %71 = vst.msk [vmem:[%s196_s1] sm:$0xff] %vm70_vm1, %v69_v24  }
  0x14   :  { %v94_v19 = vld [vmem:[#allocation0 + $0x41] ss:$8 sm:$0xf0]   ;;  %v75_v26 = vld [vmem:[#allocation0 + $0x40] ss:$8 sm:$0xf0]  }
  0x18   :  { %v92_v20 = vld [vmem:[#allocation0 + $0x41] ss:$8 sm:$0xf]   ;;  %v73_v25 = vld [vmem:[#allocation0 + $0x40] ss:$8 sm:$0xf]  }
  0x19   :  { %v96_v21 = vsel %vm68_vm0, %v94_v19, %v92_v20  ;;  %v77_v27 = vsel %vm68_vm0, %v75_v26, %v73_v25 }
  0x1a   :  { %97 = vrot.lane.b32.xlu0 %v96_v21, %s120_s0  ;;  %117 = vst.msk [vmem:[%s196_s1 + $0x8] sm:$0xff] %vm70_vm1, %v77_v27  }
  0x84   :  { %v88_v28 = vpop.permute.xlu0 %87  }
  0x85   :  { %90 = vst.msk [vmem:[%s196_s1] sm:$0xff] %vm89_vm2, %v88_v28  }
  0x8c   :  { %v98_v29 = vpop.permute.xlu0 %97  }
  0x8d   :  { %118 = vst.msk [vmem:[%s196_s1 + $0x8] sm:$0xff] %vm89_vm2, %v98_v29  }

// kernel: decoder_forward.1
= control target key start
LH: loop header
LB: loop body
LE: loop exit
PB: predicated region body
PF: predicated region fallthrough
CT: control target
= control target key end

     0   :  { %vm54_vm0 = vcmask 130048   ;;  %s2355_s27 = smov 96   ;;  %s3186_s0 = inlined_call_operand.vmem [shape: f32[16,16], index: 0, kind: input, shape index: {}]   ;;  %s3187_s1 = inlined_call_operand.vmem [shape: f32[16,32], index: 1, kind: input, shape index: {}]   ;;  %s3188_s2 = inlined_call_operand.vmem [shape: f32[16,32], index: 2, kind: input, shape index: {}]   ;;  %s3189_s3 = inlined_call_operand.vmem [shape: f32[32,32], index: 3, kind: input, shape index: {}]   ;;  %s3190_s4 = inlined_call_operand.vmem [shape: f32[16,32], index: 4, kind: input, shape index: {}]   ;;  %s3191_s5 = inlined_call_operand.vmem [shape: f32[16,48], index: 5, kind: input, shape index: {}]   ;;  %s3192_s6 = inlined_call_operand.vmem [shape: f32[32,160], index: 6, kind: input, shape index: {}]   ;;  %s3193_s7 = inlined_call_operand.vmem [shape: f32[32,32], index: 7, kind: input, shape index: {}]   ;;  %s3194_s8 = inlined_call_operand.vmem [shape: f32[64,32], index: 8, kind: input, shape index: {}]   ;;  %s3195_s9 = inlined_call_operand.vmem [shape: f32[8,64], index: 9, kind: input, shape index: {}]   ;;  %s3196_s10 = inlined_call_operand.vmem [shape: f32[32,160], index: 10, kind: input, shape index: {}]   ;;  %s3197_s11 = inlined_call_operand.vmem [shape: f32[32,32], index: 11, kind: input, shape index: {}]   ;;  %s3198_s12 = inlined_call_operand.vmem [shape: f32[64,32], index: 12, kind: input, shape index: {}]   ;;  %s3199_s13 = inlined_call_operand.vmem [shape: f32[8,64], index: 13, kind: input, shape index: {}]   ;;  %s3200_s14 = inlined_call_operand.hbm [shape: f32[16,32], index: 14, kind: output, shape index: {}]  }
   0x1   :  { %v2448_v0 = vld [vmem:[%s3192_s6 + $0x20] sm:$0xff]  ;;  %v2453_v1 = vld [vmem:[%s3192_s6 + $0x30] sm:$0xff]  ;;  %v51_v3 = vld [vmem:[%s3187_s1 + $0x8] sm:$0xff] }
   0x2   :  { %v2053_v2 = vpack.i.bf16 %v2448_v0, %v2453_v1  ;;  %v50_v4 = vld [vmem:[%s3187_s1] sm:$0xff]  ;;  %124 = vmatpush.msra.mxu1 %v2453_v1  ;;  %v2472_v6 = vld [vmem:[%s3192_s6 + $0x10] sm:$0xff]  ;;  %75 = vmatpush.msra.mxu0 %v51_v3 }
   0x3   :  { %v2467_v5 = vld [vmem:[%s3192_s6] sm:$0xff] }
   0x4   :  { %v48_v7 = vld [vmem:[%s3186_s0] sm:$0xff]  ;;  %2054 = vrot.lane.b32.xlu0 %v2053_v2, %s2355_s27  ;;  %125 = vmatpush.msra.mxu1 %v2448_v0  ;;  %v2058_v8 = vpack.i.bf16 %v2467_v5, %v2472_v6 }
   0x5   :  { %76 = vmatpush.msra.mxu0 %v50_v4 }
   0x6   :  { %1934 = vmatmul.msk.f32.vlgmr.msra.gmra.mxu0 %vm54_vm0, %v48_v7  ;;  %126 = vmatpush.msra.mxu1 %v2472_v6 }
   0x8   :  { %127 = vmatpush.msra.mxu1 %v2467_v5 }
   0x9   :  { %19 = vsyncpa [#allocation3], 0  ;;  %v49_v9 = vld [vmem:[%s3186_s0 + $0x8] sm:$0xff]  ;;  %v84_v16 = vld [vmem:[%s3189_s3] sm:$0xff]  ;;  %vm105_vm1 = vcmask 261120   ;;  %vm194_vm2 = vcmask 64512  }
   0xa   :  { %v52_v17 = vld [vmem:[%s3188_s2] sm:$0xff]  ;;  %v85_v20 = vld [vmem:[%s3189_s3 + $0x8] sm:$0xff]  ;;  %v86_v24 = vld [vmem:[%s3189_s3 + $0x10] sm:$0xff]  ;;  %s2357_s24 = smov 104   ;;  %s2358_s25 = smov 112   ;;  %vm657_vm3 = vcmask 195584  }
   0xb   :  { %v53_v21 = vld [vmem:[%s3188_s2 + $0x8] sm:$0xff]  ;;  %v87_v25 = vld [vmem:[%s3189_s3 + $0x18] sm:$0xff]  ;;  %s2356_s2 = smov 120   ;;  %v2594_v52 = vld [vmem:[%s3190_s4] sm:$0xff]  ;;  %s2360_s30 = smov 80  }
   0xc   :  { %2059 = vrot.lane.b32.xlu0 %v2058_v8, %s2355_s27  ;;  %v2601_v56 = vld [vmem:[%s3190_s4 + $0x8] sm:$0xff]  ;;  %s2359_s4 = smov 88   ;;  %s2361_s15 = smov 72  }
   0xd   :  { %s2362_s0 = smov 8   ;;  %s2363_s16 = smov 16  }
   0xe   :  { %1935 = vmatmul.msk.f32.gmra.mxu0 %vm54_vm0, %v49_v9  ;;  %s2364_s17 = smov 24   ;;  %s2366_s21 = smov 32  }
   0xf   :  { %s1922_s22 = sshll.u32 %s3200_s14, 4  ;;  %s1923_s22 = int_to_ptr.hbm [resolvable:$true] %s1922_s22 }
  0x76   :  { %v2055_v10 = vpop.permute.xlu0 %2054 }
  0x77   :  { %v2056_v11 = vunpack.i.l.bf16 %v2055_v10  ;;  %v2057_v12 = vunpack.i.h.bf16 %v2055_v10 }
  0x79   :  { %177 = vmatpush.msra.mxu2 %v2056_v11 }
  0x7b   :  { %178 = vmatpush.msra.mxu2 %v2057_v12 }
  0x7e   :  { %v2060_v13 = vpop.permute.xlu0 %2059 }
  0x7f   :  { %v2061_v14 = vunpack.i.l.bf16 %v2060_v13  ;;  %v2062_v15 = vunpack.i.h.bf16 %v2060_v13 }
  0x81   :  { %179 = vmatpush.msra.mxu2 %v2061_v14 }
  0x83   :  { %180 = vmatpush.msra.mxu2 %v2062_v15  ;;  %v78_v18 = vpop.f32.mrf.mxu0 }
  0x84   :  { %1938 = vmatmul.msk.f32.vlgmr.msra.gmra.mxu2 %vm105_vm1, %v84_v16  ;;  %v2496_v19 = vadd.f32 %v78_v18, %v52_v17 }
  0x86   :  { %1936 = vmatmul.msk.f32.vlgmr.msra.gmra.mxu1 %vm105_vm1, %v2496_v19 }
  0x8b   :  { %v81_v22 = vpop.f32.mrf.mxu0 }
  0x8c   :  { %1939 = vmatmul.msk.f32.gmra.mxu2 %vm105_vm1, %v85_v20  ;;  %v2507_v23 = vadd.f32 %v81_v22, %v53_v21 }
  0x8e   :  { %1937 = vmatmul.msk.f32.gmra.mxu1 %vm105_vm1, %v2507_v23 }
  0x94   :  { %1940 = vmatmul.msk.f32.gmra.mxu2 %vm105_vm1, %v86_v24 }
  0x9c   :  { %1941 = vmatmul.msk.f32.gmra.mxu2 %vm105_vm1, %v87_v25 }
 0x103   :  { %v129_v27 = vpop.f32.mrf.mxu1 }
 0x104   :  { %v2523_v28 = vmul.f32 0.35355338, %v129_v27 }
 0x107   :  { %v2519_v26 = vpop.f32.mrf.mxu2 }
 0x108   :  { %303 = vrot.lane.b32.xlu0 %v2519_v26, %s2356_s2 }
 0x10b   :  { %v132_v34 = vpop.f32.mrf.mxu1 }
 0x10c   :  { %v2559_v35 = vmul.f32 0.35355338, %v132_v34 }
 0x10f   :  { %v2525_v29 = vpop.f32.mrf.mxu2 }
 0x110   :  { %299 = vrot.lane.b32.xlu0 %v2523_v28, %s2356_s2  ;;  %v2531_v30 = vpack.i.bf16 %v2519_v26, %v2525_v29 }
 0x112   :  { %2064 = vrot.lane.b32.xlu2 %v2531_v30, %s2355_s27 }
 0x117   :  { %v2535_v31 = vpop.f32.mrf.mxu2 }
 0x118   :  { %305 = vrot.lane.b32.xlu0 %v2525_v29, %s2356_s2 }
 0x11a   :  { %307 = vrot.lane.b32.xlu2 %v2535_v31, %s2356_s2 }
 0x11f   :  { %v191_v32 = vpop.f32.mrf.mxu2 }
 0x120   :  { %1942 = vmatpush.xpose.msk.msrb.mxu0 %vm194_vm2, %v191_v32  ;;  %2034 = vmatpush.xpose.msk.msra.mxu3 %vm194_vm2, %v191_v32  ;;  %v2544_v33 = vpack.i.bf16 %v2535_v31, %v191_v32 }
 0x122   :  { %527 = vrot.lane.b32.xlu2 %v2535_v31, %s2357_s24  ;;  %2069 = vrot.lane.b32.xlu1 %v2544_v33, %s2355_s27 }
 0x124   :  { %1943 = vmatpush.xpose.msk.msrb.mxu0 %vm194_vm2, %v2535_v31  ;;  %2035 = vmatpush.xpose.msk.msra.mxu3 %vm194_vm2, %v2535_v31 }
 0x128   :  { %1944 = vmatpush.xpose.msk.msrb.mxu0 %vm194_vm2, %v2525_v29  ;;  %2036 = vmatpush.xpose.msk.msra.mxu3 %vm194_vm2, %v2525_v29 }
 0x12a   :  { %309 = vrot.lane.b32.xlu2 %v191_v32, %s2356_s2 }
 0x12c   :  { %1945 = vmatpush.xpose.msk.msrb.mxu0 %vm194_vm2, %v2519_v26  ;;  %2037 = vmatpush.xpose.msk.msra.mxu3 %vm194_vm2, %v2519_v26 }
 0x12f   :  { %1946 = vmatmul.msk.f32.vlgmr.msrb.gmra.mxu0 %vm194_vm2, %v2523_v28  ;;  %1947 = vmatmul.msk.f32.vlgmr.msra.gmra.mxu3 %vm194_vm2, %v2559_v35 }
 0x132   :  { %529 = vrot.lane.b32.xlu2 %v191_v32, %s2357_s24 }
 0x13a   :  { %525 = vrot.lane.b32.xlu2 %v2525_v29, %s2357_s24 }
 0x142   :  { %419 = vrot.lane.b32.xlu2 %v191_v32, %s2358_s25 }
 0x14a   :  { %301 = vrot.lane.b32.xlu2 %v2559_v35, %s2356_s2 }
 0x152   :  { %519 = vrot.lane.b32.xlu2 %v2523_v28, %s2357_s24 }
 0x15a   :  { %413 = vrot.lane.b32.xlu2 %v2519_v26, %s2358_s25 }
 0x162   :  { %521 = vrot.lane.b32.xlu2 %v2559_v35, %s2357_s24 }
 0x16c   :  { %v2065_v36 = vpop.permute.xlu2 %2064 }
 0x16d   :  { %v2066_v48 = vunpack.i.l.bf16 %v2065_v36  ;;  %v2067_v49 = vunpack.i.h.bf16 %v2065_v36 }
 0x174   :  { %v308_v37 = vpop.permute.xlu2 %307 }
 0x17a   :  { %v304_v38 = vpop.permute.xlu0 %303 }
 0x17c   :  { %v528_v39 = vpop.permute.xlu2 %527 }
 0x182   :  { %v300_v40 = vpop.permute.xlu0 %299 }
 0x184   :  { %v310_v41 = vpop.permute.xlu2 %309 }
 0x185   :  { %1950 = vmatpush.xpose.msk.msrb.mxu1 %vm194_vm2, %v310_v41 }
 0x189   :  { %1951 = vmatpush.xpose.msk.msrb.mxu1 %vm194_vm2, %v308_v37 }
 0x18a   :  { %v306_v42 = vpop.permute.xlu0 %305 }
 0x18c   :  { %v530_v43 = vpop.permute.xlu2 %529 }
 0x18d   :  { %1952 = vmatpush.xpose.msk.msrb.mxu1 %vm194_vm2, %v306_v42  ;;  %1966 = vmatpush.xpose.msk.msrb.mxu2 %vm194_vm2, %v530_v43 }
 0x191   :  { %1953 = vmatpush.xpose.msk.msrb.mxu1 %vm194_vm2, %v304_v38  ;;  %1967 = vmatpush.xpose.msk.msrb.mxu2 %vm194_vm2, %v528_v39 }
 0x194   :  { %v2070_v44 = vpop.permute.xlu1 %2069  ;;  %v526_v45 = vpop.permute.xlu2 %525  ;;  %1954 = vmatmul.msk.f32.vlgmr.msrb.gmra.mxu1 %vm194_vm2, %v300_v40 }
 0x195   :  { %v2071_v46 = vunpack.i.l.bf16 %v2070_v44  ;;  %1968 = vmatpush.xpose.msk.msrb.mxu2 %vm194_vm2, %v526_v45  ;;  %v2072_v47 = vunpack.i.h.bf16 %v2070_v44 }
 0x197   :  { %288 = vmatpush.msra.mxu0 %v2071_v46 }
 0x199   :  { %289 = vmatpush.msra.mxu0 %v2072_v47 }
 0x19b   :  { %290 = vmatpush.msra.mxu0 %v2066_v48 }
 0x19c   :  { %v420_v50 = vpop.permute.xlu2 %419 }
 0x19d   :  { %291 = vmatpush.msra.mxu0 %v2067_v49 }
 0x19f   :  { %1958 = vmatpush.xpose.msk.msrb.mxu0 %vm194_vm2, %v420_v50 }
 0x1a4   :  { %v302_v51 = vpop.permute.xlu2 %301 }
 0x1a5   :  { %1955 = vmatmul.msk.f32.gmra.mxu1 %vm194_vm2, %v302_v51 }
 0x1ac   :  { %v230_v53 = vpop.f32.mrf.mxu0  ;;  %v520_v16 = vpop.permute.xlu2 %519 }
 0x1ad   :  { %v231_v54 = vadd.f32 %v230_v53, %v2594_v52 }
 0x1af   :  { %v236_v55 = vsel %vm105_vm1, %v231_v54, -inf }
 0x1b0   :  { %237 = vmax.xlane.f32.xlu1 %v236_v55 }
 0x1b2   :  { %v233_v57 = vpop.f32.mrf.mxu3 }
 0x1b3   :  { %v234_v58 = vadd.f32 %v233_v57, %v2601_v56 }
 0x1b4   :  { %v414_v17 = vpop.permute.xlu2 %413 }
 0x1b5   :  { %v239_v59 = vsel %vm105_vm1, %v234_v58, -inf }
 0x1b8   :  { %240 = vmax.xlane.f32.xlu1 %v239_v59 }
 0x1bc   :  { %v522_v18 = vpop.permute.xlu2 %521 }
 0x211   :  { %v340_v60 = vpop.f32.mrf.mxu1 }
 0x212   :  { %v341_v14 = vadd.f32 %v340_v60, %v2594_v52 }
 0x214   :  { %v346_v15 = vsel %vm105_vm1, %v341_v14, -inf }
 0x222   :  { %v343_v61 = vpop.f32.mrf.mxu1 }
 0x223   :  { %v2606_v62 = vadd.f32 %v343_v61, %v2601_v56  ;;  %v238_v63 = vpop.xlane.xlu1 %237 }
 0x224   :  { %v242_v2 = vsub.f32 %v231_v54, %v238_v63 }
 0x225   :  { %v349_v3 = vsel %vm105_vm1, %v2606_v62, -inf }
 0x226   :  { %v244_v4 = vmul.f32 1.442695, %v242_v2  ;;  %350 = vmax.xlane.f32.xlu2 %v349_v3 }
 0x228   :  { %2227 = vpow2.f32 %v244_v4 }
 0x22b   :  { %v241_v7 = vpop.xlane.xlu1 %240 }
 0x22c   :  { %v243_v8 = vsub.f32 %v234_v58, %v241_v7 }
 0x22e   :  { %v2228_v9 = vpop.eup %2227  ;;  %v246_v10 = vmul.f32 1.442695, %v243_v8 }
 0x22f   :  { %v248_v11 = vsel %vm105_vm1, %v2228_v9, 0.0 }
 0x230   :  { %2229 = vpow2.f32 %v246_v10  ;;  %249 = vadd.xlane.f32.xlu1 %v248_v11 }
 0x236   :  { %v2230_v12 = vpop.eup %2229 }
 0x237   :  { %v251_v13 = vsel %vm105_vm1, %v2230_v12, 0.0 }
 0x238   :  { %252 = vadd.xlane.f32.xlu0 %v251_v13 }
 0x23e   :  { %2079 = vrot.lane.b32.xlu2 %v2531_v30, %s2359_s4 }
 0x240   :  { %347 = vmax.xlane.f32.xlu0 %v346_v15 }
 0x246   :  { %2094 = vrot.lane.b32.xlu2 %v2544_v33, %s2360_s30 }
 0x249   :  { %523 = vrot.lane.b32.xlu1 %v2519_v26, %s2357_s24 }
 0x251   :  { %417 = vrot.lane.b32.xlu1 %v2535_v31, %s2358_s25 }
 0x259   :  { %415 = vrot.lane.b32.xlu1 %v2525_v29, %s2358_s25 }
 0x261   :  { %409 = vrot.lane.b32.xlu1 %v2523_v28, %s2358_s25 }
 0x269   :  { %411 = vrot.lane.b32.xlu1 %v2559_v35, %s2358_s25 }
 0x299   :  { %v351_v20 = vpop.xlane.xlu2 %350 }
 0x29a   :  { %v353_v59 = vsub.f32 %v2606_v62, %v351_v20 }
 0x29c   :  { %v356_v61 = vmul.f32 1.442695, %v353_v59 }
 0x2a1   :  { %v2628_v21 = vpop.permute.xlu2 %2079 }
 0x2a2   :  { %v2081_v11 = vunpack.i.l.bf16 %v2628_v21 }
 0x2a3   :  { %v250_v22 = vpop.xlane.xlu1 %249 }
 0x2a4   :  { %2231 = vrcp.f32 %v250_v22 }
 0x2a9   :  { %v2095_v24 = vpop.permute.xlu2 %2094 }
 0x2aa   :  { %v2232_v25 = vpop.eup %2231  ;;  %v2096_v26 = vunpack.i.l.bf16 %v2095_v24  ;;  %v2097_v29 = vunpack.i.h.bf16 %v2095_v24 }
 0x2ab   :  { %v256_v27 = vmul.f32 %v2232_v25, %v2228_v9  ;;  %v253_v31 = vpop.xlane.xlu0 %252 }
 0x2ac   :  { %2233 = vrcp.f32 %v253_v31  ;;  %508 = vmatpush.msra.mxu1 %v2096_v26 }
 0x2ad   :  { %1948 = vmatmul.msk.f32.vlgmr.msra.gmra.mxu0 %vm105_vm1, %v256_v27 }
 0x2ae   :  { %509 = vmatpush.msra.mxu1 %v2097_v29 }
 0x2b2   :  { %v2234_v28 = vpop.eup %2233 }
 0x2b3   :  { %v257_v32 = vmul.f32 %v2234_v28, %v2230_v12  ;;  %v348_v45 = vpop.xlane.xlu0 %347  ;;  %v2082_v12 = vunpack.i.h.bf16 %v2628_v21 }
 0x2b4   :  { %v352_v46 = vsub.f32 %v341_v14, %v348_v45 }
 0x2b5   :  { %1949 = vmatmul.msk.f32.gmra.mxu0 %vm105_vm1, %v257_v32 }
 0x2b6   :  { %v354_v48 = vmul.f32 1.442695, %v352_v46 }
 0x2b8   :  { %2235 = vpow2.f32 %v354_v48 }
 0x2bb   :  { %v524_v34 = vpop.permute.xlu1 %523 }
 0x2bc   :  { %1969 = vmatpush.xpose.msk.msrb.mxu2 %vm194_vm2, %v524_v34 }
 0x2be   :  { %v2236_v50 = vpop.eup %2235 }
 0x2bf   :  { %1970 = vmatmul.msk.f32.vlgmr.msrb.gmra.mxu2 %vm194_vm2, %v520_v16  ;;  %v358_v51 = vsel %vm105_vm1, %v2236_v50, 0.0 }
 0x2c3   :  { %v418_v35 = vpop.permute.xlu1 %417 }
 0x2c4   :  { %1959 = vmatpush.xpose.msk.msrb.mxu0 %vm194_vm2, %v418_v35 }
 0x2c7   :  { %1971 = vmatmul.msk.f32.gmra.mxu2 %vm194_vm2, %v522_v18 }
 0x2cb   :  { %v416_v36 = vpop.permute.xlu1 %415 }
 0x2cc   :  { %1960 = vmatpush.xpose.msk.msrb.mxu0 %vm194_vm2, %v416_v36 }
 0x2d0   :  { %1961 = vmatpush.xpose.msk.msrb.mxu0 %vm194_vm2, %v414_v17 }
 0x2d3   :  { %v410_v37 = vpop.permute.xlu1 %409 }
 0x2d4   :  { %1962 = vmatmul.msk.f32.vlgmr.msrb.gmra.mxu0 %vm194_vm2, %v410_v37 }
 0x2db   :  { %v412_v38 = vpop.permute.xlu1 %411 }
 0x2dc   :  { %1963 = vmatmul.msk.f32.gmra.mxu0 %vm194_vm2, %v412_v38 }
 0x32a   :  { %v2646_v47 = vpop.f32.mrf.mxu0 }
 0x332   :  { %v2648_v49 = vpop.f32.mrf.mxu0 }
 0x342   :  { %v560_v39 = vpop.f32.mrf.mxu2 }
 0x343   :  { %v561_v40 = vadd.f32 %v560_v39, %v2594_v52 }
 0x345   :  { %v566_v41 = vsel %vm105_vm1, %v561_v40, -inf }
 0x346   :  { %567 = vmax.xlane.f32.xlu1 %v566_v41 }
 0x34a   :  { %v563_v42 = vpop.f32.mrf.mxu2 }
 0x34b   :  { %v564_v43 = vadd.f32 %v563_v42, %v2601_v56 }
 0x34d   :  { %v569_v44 = vsel %vm105_vm1, %v564_v43, -inf }
 0x34e   :  { %570 = vmax.xlane.f32.xlu0 %v569_v44 }
 0x351   :  { %v450_v53 = vpop.f32.mrf.mxu0 }
 0x352   :  { %v451_v54 = vadd.f32 %v450_v53, %v2594_v52 }
 0x354   :  { %v456_v55 = vsel %vm105_vm1, %v451_v54, -inf }
 0x359   :  { %v453_v3 = vpop.f32.mrf.mxu0 }
 0x35a   :  { %v454_v7 = vadd.f32 %v453_v3, %v2601_v56 }
 0x35c   :  { %v459_v62 = vsel %vm105_vm1, %v454_v7, -inf }
 0x362   :  { %2074 = vrot.lane.b32.xlu0 %v2544_v33, %s2359_s4 }
 0x38c   :  { %359 = vadd.xlane.f32.xlu0 %v358_v51 }
 0x394   :  { %457 = vmax.xlane.f32.xlu0 %v456_v55 }
 0x3a8   :  { %2084 = vrot.lane.b32.xlu0 %v2544_v33, %s2361_s15 }
 0x3b9   :  { %v568_v57 = vpop.xlane.xlu1 %567 }
 0x3ba   :  { %v572_v58 = vsub.f32 %v561_v40, %v568_v57 }
 0x3bc   :  { %v574_v60 = vmul.f32 1.442695, %v572_v58 }
 0x3be   :  { %2237 = vpow2.f32 %v574_v60 }
 0x3bf   :  { %2239 = vpow2.f32 %v356_v61 }
 0x3c1   :  { %v571_v4 = vpop.xlane.xlu0 %570 }
 0x3c2   :  { %v573_v56 = vsub.f32 %v564_v43, %v571_v4  ;;  %v663_v4 = vld [vmem:[%s3193_s7 + $0x18] sm:$0xff] }
 0x3c3   :  { %685 = vmatpush.msra.mxu0 %v663_v4 }
 0x3c4   :  { %v2656_v63 = vpop.eup %2237  ;;  %v576_v14 = vmul.f32 1.442695, %v573_v56 }
 0x3c5   :  { %v578_v52 = vsel %vm105_vm1, %v2656_v63, 0.0  ;;  %v2240_v2 = vpop.eup %2239 }
 0x3c6   :  { %579 = vadd.xlane.f32.xlu1 %v578_v52  ;;  %v361_v33 = vsel %vm105_vm1, %v2240_v2, 0.0 }
 0x3ce   :  { %362 = vadd.xlane.f32.xlu1 %v361_v33  ;;  %v661_v33 = vld [vmem:[%s3193_s7 + $0x8] sm:$0xff] }
 0x3d2   :  { %460 = vmax.xlane.f32.xlu0 %v459_v62  ;;  %v660_v62 = vld [vmem:[%s3193_s7] sm:$0xff] }
 0x3d4   :  { %v2075_v8 = vpop.permute.xlu0 %2074 }
 0x3d5   :  { %v2076_v9 = vunpack.i.l.bf16 %v2075_v8  ;;  %v2077_v10 = vunpack.i.h.bf16 %v2075_v8 }
 0x3d7   :  { %398 = vmatpush.msrb.mxu3 %v2076_v9 }
 0x3d9   :  { %399 = vmatpush.msrb.mxu3 %v2077_v10 }
 0x3db   :  { %400 = vmatpush.msrb.mxu3 %v2081_v11 }
 0x3dd   :  { %401 = vmatpush.msrb.mxu3 %v2082_v12 }
 0x3e6   :  { %2089 = vrot.lane.b32.xlu0 %v2531_v30, %s2361_s15 }
 0x3ff   :  { %v360_v13 = vpop.xlane.xlu0 %359 }
 0x400   :  { %2241 = vrcp.f32 %v360_v13 }
 0x401   :  { %2243 = vpow2.f32 %v576_v14 }
 0x406   :  { %v2242_v15 = vpop.eup %2241 }
 0x407   :  { %v458_v16 = vpop.xlane.xlu0 %457  ;;  %v366_v17 = vmul.f32 %v2242_v15, %v2236_v50  ;;  %v2244_v22 = vpop.eup %2243 }
 0x408   :  { %v462_v18 = vsub.f32 %v451_v54, %v458_v16  ;;  %v581_v21 = vsel %vm105_vm1, %v2244_v22, 0.0 }
 0x409   :  { %1956 = vmatmul.msk.f32.vlgmr.msrb.gmra.mxu3 %vm105_vm1, %v366_v17 }
 0x40a   :  { %v464_v20 = vmul.f32 1.442695, %v462_v18 }
 0x40c   :  { %2245 = vpow2.f32 %v464_v20 }
 0x410   :  { %582 = vadd.xlane.f32.xlu0 %v581_v21 }
 0x412   :  { %v2246_v24 = vpop.eup %2245 }
 0x413   :  { %v468_v25 = vsel %vm105_vm1, %v2246_v24, 0.0 }
 0x414   :  { %469 = vadd.xlane.f32.xlu1 %v468_v25 }
 0x41a   :  { %v2085_v26 = vpop.permute.xlu0 %2084 }
 0x41b   :  { %v2086_v27 = vunpack.i.l.bf16 %v2085_v26  ;;  %v2087_v31 = vunpack.i.h.bf16 %v2085_v26 }
 0x41d   :  { %618 = vmatpush.msra.mxu3 %v2086_v27 }
 0x41f   :  { %619 = vmatpush.msra.mxu3 %v2087_v31  ;;  %v2365_v31 = vmov 32.0  }
 0x42d   :  { %2099 = vrot.lane.b32.xlu1 %v2531_v30, %s2360_s30 }
 0x439   :  { %v580_v29 = vpop.xlane.xlu1 %579 }
 0x441   :  { %v363_v28 = vpop.xlane.xlu1 %362 }
 0x442   :  { %2247 = vrcp.f32 %v363_v28 }
 0x445   :  { %v461_v32 = vpop.xlane.xlu0 %460 }
 0x446   :  { %v463_v34 = vsub.f32 %v454_v7, %v461_v32  ;;  %v662_v7 = vld [vmem:[%s3193_s7 + $0x10] sm:$0xff] }
 0x447   :  { %686 = vmatpush.msra.mxu0 %v662_v7 }
 0x448   :  { %v2248_v35 = vpop.eup %2247  ;;  %v466_v36 = vmul.f32 1.442695, %v463_v34  ;;  %v96_v34 = vld [vmem:[%s3192_s6 + $0x28] sm:$0xff] }
 0x449   :  { %v367_v37 = vmul.f32 %v2248_v35, %v2240_v2  ;;  %687 = vmatpush.msra.mxu0 %v661_v33  ;;  %v2108_v35 = vpack.i.bf16 %v96_v34, %v2448_v0  ;;  %v2216_v34 = vld [vmem:[%s3195_s9 + $0x3] ss:$0 sm:$0xff] }
 0x44a   :  { %2249 = vpow2.f32 %v466_v36 }
 0x44b   :  { %1957 = vmatmul.msk.f32.gmra.mxu3 %vm105_vm1, %v367_v37  ;;  %2251 = vrcp.f32 %v580_v29  ;;  %688 = vmatpush.msra.mxu0 %v660_v62  ;;  %v94_v37 = vld [vmem:[%s3192_s6 + $0x8] sm:$0xff] }
 0x450   :  { %v2250_v38 = vpop.eup %2249 }
 0x451   :  { %v471_v39 = vsel %vm105_vm1, %v2250_v38, 0.0  ;;  %v2252_v41 = vpop.eup %2251 }
 0x452   :  { %472 = vadd.xlane.f32.xlu2 %v471_v39  ;;  %v586_v43 = vmul.f32 %v2252_v41, %v2656_v63  ;;  %v2118_v39 = vpack.i.bf16 %v94_v37, %v2467_v5 }
 0x458   :  { %v2090_v40 = vpop.permute.xlu0 %2089 }
 0x459   :  { %v2091_v42 = vunpack.i.l.bf16 %v2090_v40  ;;  %v2092_v30 = vunpack.i.h.bf16 %v2090_v40 }
 0x45b   :  { %620 = vmatpush.msra.mxu3 %v2091_v42 }
 0x45d   :  { %621 = vmatpush.msra.mxu3 %v2092_v30 }
 0x45e   :  { %1972 = vmatmul.msk.f32.vlgmr.msra.gmra.mxu3 %vm105_vm1, %v586_v43 }
 0x483   :  { %v583_v44 = vpop.xlane.xlu0 %582 }
 0x484   :  { %2253 = vrcp.f32 %v583_v44 }
 0x487   :  { %v470_v50 = vpop.xlane.xlu1 %469 }
 0x488   :  { %2255 = vrcp.f32 %v470_v50 }
 0x48a   :  { %v2254_v45 = vpop.eup %2253 }
 0x48b   :  { %v587_v46 = vmul.f32 %v2254_v45, %v2244_v22 }
 0x48c   :  { %v403_v48 = vpop.f32.mrf.mxu3 }
 0x48d   :  { %631 = vrot.lane.b32.xlu1 %v403_v48, %s2362_s0  ;;  %1973 = vmatmul.msk.f32.gmra.mxu3 %vm105_vm1, %v587_v46  ;;  %v95_v48 = vld [vmem:[%s3192_s6 + $0x18] sm:$0xff] }
 0x48e   :  { %v2256_v53 = vpop.eup %2255  ;;  %v2113_v50 = vpack.i.bf16 %v95_v48, %v2472_v6 }
 0x48f   :  { %v476_v57 = vmul.f32 %v2256_v53, %v2246_v24 }
 0x49f   :  { %v2100_v51 = vpop.permute.xlu1 %2099 }
 0x4a0   :  { %v2101_v54 = vunpack.i.l.bf16 %v2100_v51  ;;  %v2102_v55 = vunpack.i.h.bf16 %v2100_v51 }
 0x4a2   :  { %510 = vmatpush.msra.mxu1 %v2101_v54 }
 0x4a4   :  { %511 = vmatpush.msra.mxu1 %v2102_v55 }
 0x4a5   :  { %1964 = vmatmul.msk.f32.vlgmr.msra.gmra.mxu1 %vm105_vm1, %v476_v57 }
 0x4c5   :  { %v473_v58 = vpop.xlane.xlu2 %472 }
 0x4c6   :  { %2257 = vrcp.f32 %v473_v58 }
 0x4c7   :  { %2259 = vrcp.f32 %v2365_v31 }
 0x4cc   :  { %v2258_v59 = vpop.eup %2257 }
 0x4cd   :  { %v477_v60 = vmul.f32 %v2258_v59, %v2250_v38  ;;  %v2260_v29 = vpop.eup %2259 }
 0x4ce   :  { %v406_v61 = vpop.f32.mrf.mxu3  ;;  %v703_v28 = vmul.f32 32.0, %v2260_v29  ;;  %vm707_vm4 = vweird.f32 %v2260_v29 }
 0x4cf   :  { %633 = vrot.lane.b32.xlu0 %v406_v61, %s2362_s0  ;;  %1965 = vmatmul.msk.f32.gmra.mxu1 %vm105_vm1, %v477_v60 }
 0x4d0   :  { %v704_v32 = vsub.f32 1.0, %v703_v28 }
 0x4d2   :  { %v705_v36 = vmul.f32 %v2260_v29, %v704_v32 }
 0x4d4   :  { %v706_v38 = vadd.f32 %v2260_v29, %v705_v36 }
 0x4d6   :  { %v2728_v40 = vsel %vm707_vm4, %v2260_v29, %v706_v38 }
 0x4e1   :  { %v623_v52 = vpop.f32.mrf.mxu3 }
 0x4ff   :  { %v632_v8 = vpop.permute.xlu1 %631 }
 0x500   :  { %v653_v10 = vsel %vm194_vm2, %v2646_v47, %v632_v8  ;;  %v2213_v47 = vld [vmem:[%s3195_s9] ss:$0 sm:$0xff] }
 0x501   :  { %v665_v20 = vadd.f32 %v2213_v47, %v2496_v19  ;;  %v97_v19 = vld [vmem:[%s3192_s6 + $0x38] sm:$0xff] }
 0x510   :  { %v626_v2 = vpop.f32.mrf.mxu3 }
 0x522   :  { %v513_v63 = vpop.f32.mrf.mxu1 }
 0x523   :  { %639 = vrot.lane.b32.xlu1 %v513_v63, %s2363_s16 }
 0x52b   :  { %647 = vrot.lane.b32.xlu1 %v623_v52, %s2364_s17 }
 0x533   :  { %649 = vrot.lane.b32.xlu1 %v626_v2, %s2364_s17 }
 0x541   :  { %v634_v13 = vpop.permute.xlu0 %633 }
 0x542   :  { %v654_v14 = vsel %vm194_vm2, %v2648_v49, %v634_v13  ;;  %v666_v49 = vadd.f32 %v2213_v47, %v2507_v23  ;;  %v2103_v23 = vpack.i.bf16 %v97_v19, %v2453_v1 }
 0x54c   :  { %v516_v3 = vpop.f32.mrf.mxu1 }
 0x54d   :  { %641 = vrot.lane.b32.xlu2 %v516_v3, %s2363_s16 }
 0x595   :  { %v640_v9 = vpop.permute.xlu1 %639 }
 0x596   :  { %v655_v11 = vsel %vm54_vm0, %v653_v10, %v640_v9 }
 0x59d   :  { %v648_v12 = vpop.permute.xlu1 %647 }
 0x59e   :  { %v658_v56 = vsel %vm657_vm3, %v655_v11, %v648_v12 }
 0x59f   :  { %1974 = vmatmul.msk.f32.vlgmr.msra.gmra.mxu0 %vm105_vm1, %v658_v56 }
 0x5a5   :  { %v650_v16 = vpop.permute.xlu1 %649 }
 0x5a7   :  { %v642_v15 = vpop.permute.xlu2 %641 }
 0x5a8   :  { %v656_v17 = vsel %vm54_vm0, %v654_v14, %v642_v15  ;;  %v2214_v15 = vld [vmem:[%s3195_s9 + $0x1] ss:$0 sm:$0xff] }
 0x5a9   :  { %v659_v18 = vsel %vm657_vm3, %v656_v17, %v650_v16 }
 0x5aa   :  { %1975 = vmatmul.msk.f32.gmra.mxu0 %vm105_vm1, %v659_v18 }
 0x61c   :  { %v690_v22 = vpop.f32.mrf.mxu0 }
 0x61d   :  { %v691_v21 = vadd.f32 %v690_v22, %v665_v20 }
 0x61f   :  { %v696_v24 = vsel %vm105_vm1, %v691_v21, 0.0 }
 0x620   :  { %697 = vadd.xlane.f32.xlu1 %v696_v24 }
 0x627   :  { %v693_v25 = vpop.f32.mrf.mxu0 }
 0x628   :  { %v694_v26 = vadd.f32 %v693_v25, %v666_v49 }
 0x62a   :  { %v699_v27 = vsel %vm105_vm1, %v694_v26, 0.0 }
 0x62b   :  { %700 = vadd.xlane.f32.xlu0 %v699_v27 }
 0x639   :  { %2104 = vrot.lane.b32.xlu1 %v2103_v23, %s2366_s21 }
 0x63f   :  { %2109 = vrot.lane.b32.xlu0 %v2108_v35, %s2366_s21 }
 0x641   :  { %2119 = vrot.lane.b32.xlu1 %v2118_v39, %s2366_s21 }
 0x693   :  { %v698_v1 = vpop.xlane.xlu1 %697 }
 0x694   :  { %v709_v0 = vmul.f32 %v2728_v40, %v698_v1  ;;  %v898_v1 = vld [vmem:[%s3194_s8 + $0x38] sm:$0xff] }
 0x695   :  { %915 = vmatpush.msra.mxu2 %v898_v1 }
 0x696   :  { %v711_v41 = vsub.f32 %v691_v21, %v709_v0  ;;  %v2215_v21 = vld [vmem:[%s3195_s9 + $0x2] ss:$0 sm:$0xff] }
 0x698   :  { %v713_v42 = vmul.f32 %v711_v41, %v711_v41 }
 0x69a   :  { %v715_v30 = vsel %vm105_vm1, %v713_v42, 0.0 }
 0x69b   :  { %716 = vadd.xlane.f32.xlu2 %v715_v30  ;;  %v896_v30 = vld [vmem:[%s3194_s8 + $0x28] sm:$0xff] }
 0x69e   :  { %v701_v43 = vpop.xlane.xlu0 %700 }
 0x69f   :  { %v710_v44 = vmul.f32 %v2728_v40, %v701_v43 }
 0x6a1   :  { %v712_v45 = vsub.f32 %v694_v26, %v710_v44  ;;  %v895_v44 = vld [vmem:[%s3194_s8 + $0x20] sm:$0xff] }
 0x6a3   :  { %v714_v46 = vmul.f32 %v712_v45, %v712_v45 }
 0x6a5   :  { %v718_v5 = vsel %vm105_vm1, %v714_v46, 0.0 }
 0x6a6   :  { %719 = vadd.xlane.f32.xlu2 %v718_v5  ;;  %v894_v5 = vld [vmem:[%s3194_s8 + $0x18] sm:$0xff] }
 0x6ab   :  { %v2105_v51 = vpop.permute.xlu1 %2104 }
 0x6ac   :  { %v2107_v53 = vunpack.i.h.bf16 %v2105_v51  ;;  %v2106_v54 = vunpack.i.l.bf16 %v2105_v51  ;;  %v893_v51 = vld [vmem:[%s3194_s8 + $0x10] sm:$0xff] }
 0x6ae   :  { %v777_v55 = vsel %vm105_vm1, %v2106_v54, %v2107_v53 }
 0x6af   :  { %800 = vmatpush.msrb.mxu1 %v777_v55 }
 0x6b1   :  { %v2110_v57 = vpop.permute.xlu0 %2109 }
 0x6b2   :  { %v2112_v58 = vunpack.i.h.bf16 %v2110_v57  ;;  %v2111_v59 = vunpack.i.l.bf16 %v2110_v57  ;;  %v892_v57 = vld [vmem:[%s3194_s8 + $0x8] sm:$0xff] }
 0x6b3   :  { %v2120_v62 = vpop.permute.xlu1 %2119 }
 0x6b4   :  { %v776_v60 = vsel %vm105_vm1, %v2111_v59, %v2112_v58  ;;  %v2122_v10 = vunpack.i.h.bf16 %v2120_v62  ;;  %v2121_v11 = vunpack.i.l.bf16 %v2120_v62 }
 0x6b5   :  { %801 = vmatpush.msrb.mxu1 %v776_v60  ;;  %v891_v60 = vld [vmem:[%s3194_s8] sm:$0xff] }
 0x6b6   :  { %v774_v47 = vsel %vm105_vm1, %v2121_v11, %v2122_v10 }
 0x6be   :  { %2114 = vrot.lane.b32.xlu2 %v2113_v50, %s2366_s21 }
 0x70e   :  { %v717_v61 = vpop.xlane.xlu2 %716 }
 0x70f   :  { %v721_v63 = vmul.f32 %v717_v61, %v2728_v40 }
 0x711   :  { %v723_v52 = vadd.f32 1e-06, %v721_v63 }
 0x713   :  { %2261 = vrsqrt.f32 %v723_v52  ;;  %vm731_vm6 = vweird.f32 %v723_v52 }
 0x719   :  { %v2262_v6 = vpop.eup %2261  ;;  %v720_v2 = vpop.xlane.xlu2 %719 }
 0x71a   :  { %v726_v3 = vmul.f32 %v2262_v6, %v723_v52  ;;  %v722_v4 = vmul.f32 %v720_v2, %v2728_v40  ;;  %vm732_vm5 = vweird.f32 %v2262_v6 }
 0x71b   :  { %vm733_vm7 = vmor %vm731_vm6, %vm732_vm5 }
 0x71c   :  { %v727_v7 = vmul.f32 %v2262_v6, %v726_v3  ;;  %v724_v33 = vadd.f32 1e-06, %v722_v4 }
 0x71e   :  { %v728_v8 = vmul.f32 0.5, %v727_v7  ;;  %2263 = vrsqrt.f32 %v724_v33  ;;  %vm741_vm9 = vweird.f32 %v724_v33 }
 0x720   :  { %v729_v9 = vsub.f32 1.5, %v728_v8 }
 0x721   :  { %v2115_v12 = vpop.permute.xlu2 %2114 }
 0x722   :  { %v730_v56 = vmul.f32 %v2262_v6, %v729_v9  ;;  %v2117_v13 = vunpack.i.h.bf16 %v2115_v12  ;;  %v2116_v14 = vunpack.i.l.bf16 %v2115_v12 }
 0x724   :  { %v2264_v16 = vpop.eup %2263  ;;  %v734_v17 = vsel %vm733_vm7, %v2262_v6, %v730_v56  ;;  %v775_v18 = vsel %vm105_vm1, %v2116_v14, %v2117_v13 }
 0x725   :  { %v745_v20 = vmul.f32 %v734_v17, %v711_v41  ;;  %v736_v22 = vmul.f32 %v2264_v16, %v724_v33  ;;  %802 = vmatpush.msrb.mxu1 %v775_v18  ;;  %vm742_vm8 = vweird.f32 %v2264_v16  ;;  %v897_v41 = vld [vmem:[%s3194_s8 + $0x30] sm:$0xff] }
 0x726   :  { %vm743_vm10 = vmor %vm741_vm9, %vm742_vm8  ;;  %916 = vmatpush.msra.mxu2 %v897_v41  ;;  %vm900_vm8 = vcmask 523264  }
 0x727   :  { %v748_v24 = vmul.f32 %v2214_v15, %v745_v20  ;;  %v737_v49 = vmul.f32 %v2264_v16, %v736_v22  ;;  %803 = vmatpush.msrb.mxu1 %v774_v47 }
 0x728   :  { %917 = vmatpush.msra.mxu2 %v896_v30 }
 0x729   :  { %v738_v25 = vmul.f32 0.5, %v737_v49  ;;  %v2752_v26 = vadd.f32 %v2215_v21, %v748_v24 }
 0x72a   :  { %918 = vmatpush.msra.mxu2 %v895_v44 }
 0x72b   :  { %v739_v27 = vsub.f32 1.5, %v738_v25  ;;  %1976 = vmatmul.msk.f32.vlgmr.msrb.gmra.mxu1 %vm105_vm1, %v2752_v26 }
 0x72c   :  { %919 = vmatpush.msra.mxu2 %v894_v5 }
 0x72d   :  { %v740_v31 = vmul.f32 %v2264_v16, %v739_v27 }
 0x72e   :  { %920 = vmatpush.msra.mxu2 %v893_v51 }
 0x72f   :  { %v744_v29 = vsel %vm743_vm10, %v2264_v16, %v740_v31 }
 0x730   :  { %v746_v28 = vmul.f32 %v744_v29, %v712_v45  ;;  %921 = vmatpush.msra.mxu2 %v892_v57 }
 0x732   :  { %v749_v32 = vmul.f32 %v2214_v15, %v746_v28  ;;  %922 = vmatpush.msra.mxu2 %v891_v60 }
 0x734   :  { %v2756_v19 = vadd.f32 %v2215_v21, %v749_v32 }
 0x736   :  { %1977 = vmatmul.msk.f32.gmra.mxu1 %vm105_vm1, %v2756_v19 }
 0x7a8   :  { %v805_v23 = vpop.f32.mrf.mxu1 }
 0x7a9   :  { %v2763_v35 = vadd.f32 %v2216_v34, %v805_v23 }
 0x7ab   :  { %v2766_v36 = vmul.f32 0.70710677, %v2763_v35  ;;  %v811_v30 = vmul.f32 0.5, %v2763_v35  ;;  %v2217_v35 = vld [vmem:[%s3195_s9 + $0x4] ss:$0 sm:$0xff] }
 0x7ad   :  { %v819_v37 = vand.u32 2147483647, %v2766_v36  ;;  %vm815_vm7 = vcmp.ge.f32.partialorder %v2766_v36, 0.0 }
 0x7af   :  { %v821_v38 = vmul.f32 0.3275911, %v819_v37  ;;  %v873_v2 = vsub.f32 0.0, %v819_v37 }
 0x7b1   :  { %v823_v39 = vadd.f32 1.0, %v821_v38  ;;  %v875_v62 = vmul.f32 %v873_v2, %v819_v37  ;;  %v2367_v38 = vmov -1.0   ;;  %v2822_v2 = vld [vmem:[%s3196_s10 + $0x30] sm:$0xff] }
 0x7b2   :  { %1017 = vmatpush.msrb.mxu3 %v2822_v2 }
 0x7b3   :  { %2265 = vrcp.f32 %v823_v39  ;;  %v808_v0 = vpop.f32.mrf.mxu1  ;;  %v836_v55 = vand.u32 2147483648, %v823_v39  ;;  %v834_v59 = vand.u32 2147483647, %v823_v39  ;;  %vm830_vm12 = vweird.f32 %v823_v39 }
 0x7b4   :  { %v2775_v42 = vadd.f32 %v2216_v34, %v808_v0  ;;  %v877_v13 = vmul.f32 1.442695, %v875_v62 }
 0x7b5   :  { %v837_v63 = vor.u32 1.1754944e-38, %v836_v55  ;;  %vm835_vm14 = vcmp.eq.f32.partialorder %v834_v59, 8.507059e+37 }
 0x7b6   :  { %v2781_v43 = vmul.f32 0.70710677, %v2775_v42 }
 0x7b8   :  { %v820_v45 = vand.u32 2147483647, %v2781_v43  ;;  %vm816_vm9 = vcmp.ge.f32.partialorder %v2781_v43, 0.0 }
 0x7b9   :  { %v2266_v46 = vpop.eup %2265  ;;  %v818_v51 = vsel %vm816_vm9, 1.0, %v2367_v38 }
 0x7ba   :  { %v826_v48 = vmul.f32 %v2266_v46, %v823_v39  ;;  %v822_v50 = vmul.f32 0.3275911, %v820_v45  ;;  %vm831_vm11 = vweird.f32 %v2266_v46  ;;  %v874_v47 = vsub.f32 0.0, %v820_v45 }
 0x7bb   :  { %vm832_vm13 = vmor %vm830_vm12, %vm831_vm11  ;;  %v817_v39 = vsel %vm815_vm7, 1.0, %v2367_v38 }
 0x7bc   :  { %v827_v53 = vsub.f32 1.0, %v826_v48  ;;  %v824_v54 = vadd.f32 1.0, %v822_v50  ;;  %v876_v25 = vmul.f32 %v874_v47, %v820_v45 }
 0x7be   :  { %v828_v58 = vmul.f32 %v2266_v46, %v827_v53  ;;  %2267 = vrcp.f32 %v824_v54  ;;  %v851_v10 = vand.u32 2147483648, %v824_v54  ;;  %v849_v12 = vand.u32 2147483647, %v824_v54 }
 0x7bf   :  { %vm845_vm4 = vweird.f32 %v824_v54  ;;  %2269 = vpow2.f32 %v877_v13  ;;  %v879_v34 = vmul.f32 1.442695, %v876_v25 }
 0x7c0   :  { %v829_v61 = vadd.f32 %v2266_v46, %v828_v58  ;;  %v852_v16 = vor.u32 1.1754944e-38, %v851_v10  ;;  %vm850_vm6 = vcmp.eq.f32.partialorder %v849_v12, 8.507059e+37 }
 0x7c1   :  { %2271 = vpow2.f32 %v879_v34 }
 0x7c2   :  { %v833_v52 = vsel %vm832_vm13, %v2266_v46, %v829_v61 }
 0x7c3   :  { %v838_v6 = vsel %vm835_vm14, %v837_v63, %v833_v52 }
 0x7c4   :  { %v2268_v3 = vpop.eup %2267  ;;  %v855_v4 = vmul.f32 1.0614054, %v838_v6 }
 0x7c5   :  { %v841_v7 = vmul.f32 %v2268_v3, %v824_v54  ;;  %vm846_vm15 = vweird.f32 %v2268_v3  ;;  %v2270_v29 = vpop.eup %2269  ;;  %v812_v54 = vmul.f32 0.5, %v2775_v42 }
 0x7c6   :  { %v857_v33 = vadd.f32 -1.4531521, %v855_v4  ;;  %vm847_vm5 = vmor %vm845_vm4, %vm846_vm15  ;;  %vm1128_vm4 = vcmask 392192  }
 0x7c7   :  { %v842_v8 = vsub.f32 1.0, %v841_v7  ;;  %v2272_v48 = vpop.eup %2271 }
 0x7c8   :  { %v859_v9 = vmul.f32 %v857_v33, %v838_v6 }
 0x7c9   :  { %v843_v11 = vmul.f32 %v2268_v3, %v842_v8 }
 0x7ca   :  { %v861_v56 = vadd.f32 1.4214138, %v859_v9 }
 0x7cb   :  { %v844_v14 = vadd.f32 %v2268_v3, %v843_v11 }
 0x7cc   :  { %v863_v15 = vmul.f32 %v861_v56, %v838_v6 }
 0x7cd   :  { %v848_v17 = vsel %vm847_vm5, %v2268_v3, %v844_v14  ;;  %v2834_v3 = vld [vmem:[%s3196_s10 + $0x10] sm:$0xff] }
 0x7ce   :  { %v865_v18 = vadd.f32 -0.28449672, %v863_v15  ;;  %v853_v20 = vsel %vm850_vm6, %v852_v16, %v848_v17 }
 0x7cf   :  { %v856_v22 = vmul.f32 1.0614054, %v853_v20 }
 0x7d0   :  { %v867_v21 = vmul.f32 %v865_v18, %v838_v6 }
 0x7d1   :  { %v858_v24 = vadd.f32 -1.4531521, %v856_v22  ;;  %v2326_v22 = vld [vmem:[%s3189_s3 + $0x8] sm:$0xff] }
 0x7d2   :  { %v869_v49 = vadd.f32 0.2548296, %v867_v21 }
 0x7d3   :  { %v860_v27 = vmul.f32 %v858_v24, %v853_v20 }
 0x7d4   :  { %v871_v31 = vmul.f32 %v869_v49, %v838_v6  ;;  %v2817_v6 = vld [vmem:[%s3196_s10 + $0x20] sm:$0xff] }
 0x7d5   :  { %v862_v28 = vadd.f32 1.4214138, %v860_v27  ;;  %1018 = vmatpush.msrb.mxu3 %v2817_v6 }
 0x7d6   :  { %v881_v32 = vmul.f32 %v2270_v29, %v871_v31 }
 0x7d7   :  { %v864_v23 = vmul.f32 %v862_v28, %v853_v20  ;;  %1019 = vmatpush.msrb.mxu3 %v2834_v3 }
 0x7d8   :  { %v883_v37 = vsub.f32 1.0, %v881_v32 }
 0x7d9   :  { %v866_v1 = vadd.f32 -0.28449672, %v864_v23 }
 0x7da   :  { %v885_v0 = vmul.f32 %v883_v37, %v817_v39  ;;  %v2218_v39 = vld [vmem:[%s3195_s9 + $0x5] ss:$0 sm:$0xff] }
 0x7db   :  { %v868_v41 = vmul.f32 %v866_v1, %v853_v20 }
 0x7dc   :  { %v887_v44 = vadd.f32 1.0, %v885_v0 }
 0x7dd   :  { %v870_v45 = vadd.f32 0.2548296, %v868_v41 }
 0x7de   :  { %v889_v46 = vmul.f32 %v887_v44, %v811_v30  ;;  %v2219_v44 = vld [vmem:[%s3195_s9 + $0x6] ss:$0 sm:$0xff] }
 0x7df   :  { %v872_v5 = vmul.f32 %v870_v45, %v853_v20  ;;  %v2325_v20 = vld [vmem:[%s3189_s3] sm:$0xff] }
 0x7e0   :  { %1978 = vmatmul.msk.f32.vlgmr.msra.gmra.mxu2 %vm900_vm8, %v889_v46 }
 0x7e1   :  { %v882_v36 = vmul.f32 %v2272_v48, %v872_v5 }
 0x7e3   :  { %v884_v50 = vsub.f32 1.0, %v882_v36 }
 0x7e5   :  { %v886_v53 = vmul.f32 %v884_v50, %v818_v51 }
 0x7e7   :  { %v888_v55 = vadd.f32 1.0, %v886_v53 }
 0x7e9   :  { %v890_v57 = vmul.f32 %v888_v55, %v812_v54  ;;  %v2327_v55 = vld [vmem:[%s3189_s3 + $0x10] sm:$0xff] }
 0x7eb   :  { %1979 = vmatmul.msk.f32.gmra.mxu2 %vm900_vm8, %v890_v57 }
 0x863   :  { %v924_v58 = vpop.f32.mrf.mxu2 }
 0x864   :  { %v925_v59 = vadd.f32 %v2217_v35, %v924_v58 }
 0x866   :  { %v930_v60 = vadd.f32 %v925_v59, %v2752_v26  ;;  %v2123_v26 = vpack.i.bf16 %v2817_v6, %v2822_v2 }
 0x868   :  { %v932_v43 = vsel %vm105_vm1, %v930_v60, 0.0 }
 0x869   :  { %933 = vadd.xlane.f32.xlu0 %v932_v43 }
 0x86e   :  { %v927_v61 = vpop.f32.mrf.mxu2 }
 0x86f   :  { %v928_v63 = vadd.f32 %v2217_v35, %v927_v61  ;;  %v2328_v35 = vld [vmem:[%s3189_s3 + $0x18] sm:$0xff] }
 0x871   :  { %v931_v52 = vadd.f32 %v928_v63, %v2756_v19  ;;  %v2829_v19 = vld [vmem:[%s3196_s10] sm:$0xff] }
 0x872   :  { %v2128_v4 = vpack.i.bf16 %v2829_v19, %v2834_v3  ;;  %1020 = vmatpush.msrb.mxu3 %v2829_v19 }
 0x873   :  { %v935_v42 = vsel %vm105_vm1, %v931_v52, 0.0 }
 0x874   :  { %936 = vadd.xlane.f32.xlu1 %v935_v42 }
 0x87d   :  { %2124 = vrot.lane.b32.xlu0 %v2123_v26, %s2355_s27 }
 0x88d   :  { %2129 = vrot.lane.b32.xlu1 %v2128_v4, %s2355_s27 }
 0x8dc   :  { %v934_v7 = vpop.xlane.xlu0 %933 }
 0x8dd   :  { %v938_v33 = vmul.f32 %v934_v7, %v2728_v40 }
 0x8df   :  { %v940_v62 = vsub.f32 %v930_v60, %v938_v33 }
 0x8e1   :  { %v942_v8 = vmul.f32 %v940_v62, %v940_v62 }
 0x8e3   :  { %v944_v9 = vsel %vm105_vm1, %v942_v8, 0.0 }
 0x8e4   :  { %945 = vadd.xlane.f32.xlu2 %v944_v9 }
 0x8e7   :  { %v937_v10 = vpop.xlane.xlu1 %936 }
 0x8e8   :  { %v939_v11 = vmul.f32 %v937_v10, %v2728_v40 }
 0x8ea   :  { %v941_v12 = vsub.f32 %v931_v52, %v939_v11 }
 0x8ec   :  { %v943_v56 = vmul.f32 %v941_v12, %v941_v12 }
 0x8ee   :  { %v947_v13 = vsel %vm105_vm1, %v943_v56, 0.0 }
 0x8ef   :  { %948 = vadd.xlane.f32.xlu2 %v947_v13  ;;  %v2125_v14 = vpop.permute.xlu0 %2124 }
 0x8f0   :  { %v2127_v15 = vunpack.i.h.bf16 %v2125_v14  ;;  %v2126_v16 = vunpack.i.l.bf16 %v2125_v14 }
 0x8f2   :  { %1058 = vmatpush.msrb.mxu0 %v2126_v16 }
 0x8f4   :  { %1059 = vmatpush.msrb.mxu0 %v2127_v15 }
 0x8ff   :  { %v2130_v17 = vpop.permute.xlu1 %2129 }
 0x900   :  { %v2131_v18 = vunpack.i.l.bf16 %v2130_v17  ;;  %v2132_v47 = vunpack.i.h.bf16 %v2130_v17 }
 0x902   :  { %1060 = vmatpush.msrb.mxu0 %v2131_v18 }
 0x904   :  { %1061 = vmatpush.msrb.mxu0 %v2132_v47 }
 0x905   :  { %1982 = vmatmul.msk.f32.vlgmr.msrb.gmra.mxu0 %vm105_vm1, %v2325_v20 }
 0x90d   :  { %1983 = vmatmul.msk.f32.gmra.mxu0 %vm105_vm1, %v2326_v22 }
 0x957   :  { %v946_v21 = vpop.xlane.xlu2 %945 }
 0x958   :  { %v950_v24 = vmul.f32 %v946_v21, %v2728_v40 }
 0x95a   :  { %v952_v49 = vadd.f32 1e-06, %v950_v24 }
 0x95c   :  { %2273 = vrsqrt.f32 %v952_v49  ;;  %vm960_vm11 = vweird.f32 %v952_v49 }
 0x962   :  { %v2274_v25 = vpop.eup %2273  ;;  %v949_v27 = vpop.xlane.xlu2 %948 }
 0x963   :  { %v955_v31 = vmul.f32 %v2274_v25, %v952_v49  ;;  %v951_v29 = vmul.f32 %v949_v27, %v2728_v40  ;;  %vm961_vm10 = vweird.f32 %v2274_v25 }
 0x964   :  { %vm962_vm12 = vmor %vm960_vm11, %vm961_vm10 }
 0x965   :  { %v956_v28 = vmul.f32 %v2274_v25, %v955_v31  ;;  %v953_v32 = vadd.f32 1e-06, %v951_v29 }
 0x967   :  { %v957_v34 = vmul.f32 0.5, %v956_v28  ;;  %2275 = vrsqrt.f32 %v953_v32  ;;  %vm970_vm14 = vweird.f32 %v953_v32 }
 0x969   :  { %v958_v23 = vsub.f32 1.5, %v957_v34 }
 0x96b   :  { %v959_v37 = vmul.f32 %v2274_v25, %v958_v23  ;;  %v2950_v23 = vld [vmem:[%s3191_s5] sm:$0xff] }
 0x96d   :  { %v2276_v1 = vpop.eup %2275  ;;  %v963_v0 = vsel %vm962_vm12, %v2274_v25, %v959_v37 }
 0x96e   :  { %v974_v41 = vmul.f32 %v963_v0, %v940_v62  ;;  %v965_v30 = vmul.f32 %v2276_v1, %v953_v32  ;;  %vm971_vm13 = vweird.f32 %v2276_v1 }
 0x96f   :  { %vm972_vm15 = vmor %vm970_vm14, %vm971_vm13 }
 0x970   :  { %v977_v45 = vmul.f32 %v2218_v39, %v974_v41  ;;  %v966_v46 = vmul.f32 %v2276_v1, %v965_v30 }
 0x972   :  { %v967_v5 = vmul.f32 0.5, %v966_v46  ;;  %v2864_v48 = vadd.f32 %v2219_v44, %v977_v45 }
 0x974   :  { %v968_v36 = vsub.f32 1.5, %v967_v5  ;;  %1980 = vmatmul.msk.f32.vlgmr.msrb.gmra.mxu3 %vm105_vm1, %v2864_v48  ;;  %1984 = vmatmul.msk.f32.gmra.mxu0 %vm105_vm1, %v2864_v48 }
 0x976   :  { %v969_v50 = vmul.f32 %v2276_v1, %v968_v36 }
 0x978   :  { %v973_v51 = vsel %vm972_vm15, %v2276_v1, %v969_v50 }
 0x979   :  { %v975_v53 = vmul.f32 %v973_v51, %v941_v12 }
 0x97b   :  { %v978_v54 = vmul.f32 %v2218_v39, %v975_v53 }
 0x97c   :  { %1985 = vmatmul.msk.f32.gmra.mxu0 %vm105_vm1, %v2327_v55 }
 0x97d   :  { %v2874_v57 = vadd.f32 %v2219_v44, %v978_v54  ;;  %v2961_v44 = vld [vmem:[%s3191_s5 + $0x8] sm:$0xff] }
 0x97f   :  { %1981 = vmatmul.msk.f32.gmra.mxu3 %vm105_vm1, %v2874_v57 }
 0x982   :  { %v1063_v58 = vpop.f32.mrf.mxu0 }
 0x984   :  { %1986 = vmatmul.msk.f32.gmra.mxu0 %vm105_vm1, %v2328_v35 }
 0x98a   :  { %v1066_v59 = vpop.f32.mrf.mxu0 }
 0x98b   :  { %v2926_v62 = vpack.i.bf16 %v1063_v58, %v1066_v59 }
 0x98c   :  { %1987 = vmatmul.msk.f32.gmra.mxu0 %vm105_vm1, %v2874_v57 }
 0x9f1   :  { %v1069_v60 = vpop.f32.mrf.mxu0 }
 0x9f2   :  { %1206 = vrot.lane.b32.xlu1 %v1069_v60, %s2356_s2 }
 0x9f7   :  { %v1022_v63 = vpop.f32.mrf.mxu3 }
 0x9f8   :  { %v1028_v52 = vmul.f32 0.35355338, %v1022_v63 }
 0x9f9   :  { %v1072_v43 = vpop.f32.mrf.mxu0 }
 0x9fa   :  { %1202 = vrot.lane.b32.xlu1 %v1063_v58, %s2356_s2  ;;  %1208 = vrot.lane.b32.xlu0 %v1072_v43, %s2356_s2  ;;  %v2887_v61 = vpack.i.bf16 %v1069_v60, %v1072_v43 }
 0xa01   :  { %v1075_v42 = vpop.f32.mrf.mxu0 }
 0xa02   :  { %1198 = vrot.lane.b32.xlu1 %v1028_v52, %s2356_s2  ;;  %1204 = vrot.lane.b32.xlu0 %v1066_v59, %s2356_s2  ;;  %v1025_v4 = vpop.f32.mrf.mxu3 }
 0xa03   :  { %1210 = vrot.lane.b32.xlu2 %v1075_v42, %s2356_s2  ;;  %v1029_v7 = vmul.f32 0.35355338, %v1025_v4 }
 0xa09   :  { %v1078_v26 = vpop.f32.mrf.mxu0 }
 0xa0a   :  { %1458 = vrot.lane.b32.xlu1 %v1075_v42, %s2357_s24  ;;  %1212 = vrot.lane.b32.xlu0 %v1078_v26, %s2356_s2  ;;  %v2919_v33 = vpack.i.bf16 %v1075_v42, %v1078_v26 }
 0xa0b   :  { %1332 = vrot.lane.b32.xlu2 %v1072_v43, %s2358_s25  ;;  %1988 = vmatpush.xpose.msk.msra.mxu1 %vm194_vm2, %v1078_v26 }
 0xa0f   :  { %1989 = vmatpush.xpose.msk.msra.mxu1 %vm194_vm2, %v1075_v42 }
 0xa12   :  { %1456 = vrot.lane.b32.xlu1 %v1072_v43, %s2357_s24  ;;  %1334 = vrot.lane.b32.xlu0 %v1075_v42, %s2358_s25 }
 0xa13   :  { %1460 = vrot.lane.b32.xlu2 %v1078_v26, %s2357_s24  ;;  %1990 = vmatpush.xpose.msk.msra.mxu1 %vm194_vm2, %v1072_v43 }
 0xa17   :  { %1991 = vmatpush.xpose.msk.msra.mxu1 %vm194_vm2, %v1069_v60 }
 0xa1a   :  { %1328 = vrot.lane.b32.xlu1 %v1066_v59, %s2358_s25  ;;  %1200 = vrot.lane.b32.xlu0 %v1029_v7, %s2356_s2 }
 0xa1b   :  { %1330 = vrot.lane.b32.xlu2 %v1069_v60, %s2358_s25  ;;  %1992 = vmatpush.xpose.msk.msra.mxu1 %vm194_vm2, %v1066_v59 }
 0xa1f   :  { %1993 = vmatpush.xpose.msk.msra.mxu1 %vm194_vm2, %v1063_v58 }
 0xa22   :  { %1994 = vmatmul.msk.f32.vlgmr.msra.gmra.mxu1 %vm194_vm2, %v1028_v52  ;;  %1450 = vrot.lane.b32.xlu1 %v1063_v58, %s2357_s24 }
 0xa23   :  { %1452 = vrot.lane.b32.xlu2 %v1066_v59, %s2357_s24  ;;  %1336 = vrot.lane.b32.xlu0 %v1078_v26, %s2358_s25 }
 0xa2a   :  { %1995 = vmatmul.msk.f32.gmra.mxu1 %vm194_vm2, %v1029_v7  ;;  %1324 = vrot.lane.b32.xlu1 %v1029_v7, %s2358_s25 }
 0xa2b   :  { %1322 = vrot.lane.b32.xlu2 %v1028_v52, %s2358_s25  ;;  %1454 = vrot.lane.b32.xlu0 %v1069_v60, %s2357_s24 }
 0xa32   :  { %2134 = vrot.lane.b32.xlu1 %v2887_v61, %s2355_s27 }
 0xa33   :  { %1448 = vrot.lane.b32.xlu2 %v1029_v7, %s2357_s24  ;;  %1326 = vrot.lane.b32.xlu0 %v1063_v58, %s2358_s25 }
 0xa3a   :  { %2144 = vrot.lane.b32.xlu1 %v2887_v61, %s2359_s4 }
 0xa3b   :  { %2149 = vrot.lane.b32.xlu2 %v2919_v33, %s2355_s27  ;;  %1446 = vrot.lane.b32.xlu0 %v1028_v52, %s2357_s24 }
 0xa42   :  { %2154 = vrot.lane.b32.xlu1 %v2919_v33, %s2359_s4 }
 0xa43   :  { %2164 = vrot.lane.b32.xlu2 %v2919_v33, %s2360_s30  ;;  %2139 = vrot.lane.b32.xlu0 %v2926_v62, %s2355_s27 }
 0xa5d   :  { %v1211_v8 = vpop.permute.xlu2 %1210 }
 0xa64   :  { %v1207_v9 = vpop.permute.xlu1 %1206 }
 0xa65   :  { %v1333_v10 = vpop.permute.xlu2 %1332 }
 0xa6c   :  { %v1203_v11 = vpop.permute.xlu1 %1202  ;;  %v1209_v12 = vpop.permute.xlu0 %1208 }
 0xa6d   :  { %v1461_v56 = vpop.permute.xlu2 %1460 }
 0xa74   :  { %v1199_v13 = vpop.permute.xlu1 %1198  ;;  %v1205_v14 = vpop.permute.xlu0 %1204 }
 0xa75   :  { %v1331_v15 = vpop.permute.xlu2 %1330 }
 0xa7c   :  { %v1459_v16 = vpop.permute.xlu1 %1458  ;;  %v1213_v17 = vpop.permute.xlu0 %1212 }
 0xa7d   :  { %v1453_v18 = vpop.permute.xlu2 %1452  ;;  %1998 = vmatpush.xpose.msk.msra.mxu3 %vm194_vm2, %v1213_v17 }
 0xa81   :  { %1999 = vmatpush.xpose.msk.msra.mxu3 %vm194_vm2, %v1211_v8 }
 0xa84   :  { %v1457_v47 = vpop.permute.xlu1 %1456  ;;  %v1335_v20 = vpop.permute.xlu0 %1334 }
 0xa85   :  { %v1323_v22 = vpop.permute.xlu2 %1322  ;;  %2000 = vmatpush.xpose.msk.msra.mxu3 %vm194_vm2, %v1209_v12 }
 0xa89   :  { %2001 = vmatpush.xpose.msk.msra.mxu3 %vm194_vm2, %v1207_v9 }
 0xa8c   :  { %v1329_v21 = vpop.permute.xlu1 %1328  ;;  %v1201_v24 = vpop.permute.xlu0 %1200 }
 0xa8d   :  { %v1449_v49 = vpop.permute.xlu2 %1448  ;;  %2002 = vmatpush.xpose.msk.msra.mxu3 %vm194_vm2, %v1205_v14 }
 0xa91   :  { %2003 = vmatpush.xpose.msk.msra.mxu3 %vm194_vm2, %v1203_v11 }
 0xa94   :  { %v1451_v25 = vpop.permute.xlu1 %1450  ;;  %2004 = vmatmul.msk.f32.vlgmr.msra.gmra.mxu3 %vm194_vm2, %v1199_v13 }
 0xa95   :  { %2018 = vmatpush.xpose.msk.msrb.mxu3 %vm194_vm2, %v1461_v56  ;;  %v2150_v27 = vpop.permute.xlu2 %2149  ;;  %v1337_v31 = vpop.permute.xlu0 %1336 }
 0xa96   :  { %v2151_v29 = vunpack.i.l.bf16 %v2150_v27  ;;  %2008 = vmatpush.xpose.msk.msrb.mxu1 %vm194_vm2, %v1337_v31  ;;  %v2152_v28 = vunpack.i.h.bf16 %v2150_v27 }
 0xa98   :  { %1185 = vmatpush.msrb.mxu2 %v2151_v29 }
 0xa99   :  { %2019 = vmatpush.xpose.msk.msrb.mxu3 %vm194_vm2, %v1459_v16 }
 0xa9a   :  { %1186 = vmatpush.msrb.mxu2 %v2152_v28  ;;  %2009 = vmatpush.xpose.msk.msrb.mxu1 %vm194_vm2, %v1335_v20 }
 0xa9c   :  { %v1325_v32 = vpop.permute.xlu1 %1324  ;;  %2005 = vmatmul.msk.f32.gmra.mxu3 %vm194_vm2, %v1201_v24 }
 0xa9d   :  { %2020 = vmatpush.xpose.msk.msrb.mxu3 %vm194_vm2, %v1457_v47  ;;  %v1455_v34 = vpop.permute.xlu0 %1454 }
 0xa9e   :  { %2010 = vmatpush.xpose.msk.msrb.mxu1 %vm194_vm2, %v1333_v10 }
 0xa9f   :  { %v1122_v37 = vpop.f32.mrf.mxu1 }
 0xaa0   :  { %v1123_v39 = vadd.f32 %v1122_v37, %v2950_v23 }
 0xaa1   :  { %2021 = vmatpush.xpose.msk.msrb.mxu3 %vm194_vm2, %v1455_v34 }
 0xaa2   :  { %2011 = vmatpush.xpose.msk.msrb.mxu1 %vm194_vm2, %v1331_v15  ;;  %v1129_v1 = vsel %vm1128_vm4, %v1123_v39, -inf }
 0xaa3   :  { %1130 = vmax.xlane.f32.xlu0 %v1129_v1 }
 0xaa4   :  { %v2135_v0 = vpop.permute.xlu1 %2134 }
 0xaa5   :  { %2022 = vmatpush.xpose.msk.msrb.mxu3 %vm194_vm2, %v1453_v18  ;;  %v2136_v41 = vunpack.i.l.bf16 %v2135_v0  ;;  %v1327_v30 = vpop.permute.xlu0 %1326  ;;  %v2137_v45 = vunpack.i.h.bf16 %v2135_v0 }
 0xaa6   :  { %2012 = vmatpush.xpose.msk.msrb.mxu1 %vm194_vm2, %v1329_v21 }
 0xaa7   :  { %v1125_v46 = vpop.f32.mrf.mxu1  ;;  %1187 = vmatpush.msrb.mxu2 %v2136_v41 }
 0xaa8   :  { %v1126_v5 = vadd.f32 %v1125_v46, %v2961_v44 }
 0xaa9   :  { %2023 = vmatpush.xpose.msk.msrb.mxu3 %vm194_vm2, %v1451_v25  ;;  %1188 = vmatpush.msrb.mxu2 %v2137_v45 }
 0xaaa   :  { %2013 = vmatpush.xpose.msk.msrb.mxu1 %vm194_vm2, %v1327_v30  ;;  %v1132_v36 = vsel %vm1128_vm4, %v1126_v5, -inf }
 0xaab   :  { %1133 = vmax.xlane.f32.xlu1 %v1132_v36 }
 0xaac   :  { %v2145_v50 = vpop.permute.xlu1 %2144 }
 0xaad   :  { %v1447_v51 = vpop.permute.xlu0 %1446  ;;  %2014 = vmatmul.msk.f32.vlgmr.msrb.gmra.mxu1 %vm194_vm2, %v1323_v22  ;;  %v2146_v60 = vunpack.i.l.bf16 %v2145_v50  ;;  %v2147_v43 = vunpack.i.h.bf16 %v2145_v50 }
 0xaae   :  { %2024 = vmatmul.msk.f32.vlgmr.msrb.gmra.mxu3 %vm194_vm2, %v1447_v51 }
 0xab4   :  { %v2155_v54 = vpop.permute.xlu1 %2154 }
 0xab5   :  { %v2140_v53 = vpop.permute.xlu0 %2139  ;;  %2015 = vmatmul.msk.f32.gmra.mxu1 %vm194_vm2, %v1325_v32  ;;  %v2156_v58 = vunpack.i.l.bf16 %v2155_v54  ;;  %v2157_v59 = vunpack.i.h.bf16 %v2155_v54 }
 0xab6   :  { %v2141_v55 = vunpack.i.l.bf16 %v2140_v53  ;;  %2025 = vmatmul.msk.f32.gmra.mxu3 %vm194_vm2, %v1449_v49  ;;  %v2142_v35 = vunpack.i.h.bf16 %v2140_v53 }
 0xab8   :  { %1189 = vmatpush.msrb.mxu2 %v2141_v55 }
 0xaba   :  { %1190 = vmatpush.msrb.mxu2 %v2142_v35 }
 0xabc   :  { %1309 = vmatpush.msra.mxu2 %v2156_v58 }
 0xabe   :  { %1310 = vmatpush.msra.mxu2 %v2157_v59 }
 0xac0   :  { %1311 = vmatpush.msra.mxu2 %v2146_v60 }
 0xac2   :  { %1312 = vmatpush.msra.mxu2 %v2147_v43 }
 0xac4   :  { %2159 = vrot.lane.b32.xlu1 %v2926_v62, %s2359_s4 }
 0xb16   :  { %v1131_v9 = vpop.xlane.xlu0 %1130 }
 0xb17   :  { %v1247_v63 = vpop.f32.mrf.mxu3  ;;  %v1135_v13 = vsub.f32 %v1123_v39, %v1131_v9 }
 0xb18   :  { %v1248_v52 = vadd.f32 %v1247_v63, %v2950_v23 }
 0xb19   :  { %v1137_v15 = vmul.f32 1.442695, %v1135_v13 }
 0xb1a   :  { %v1253_v42 = vsel %vm1128_vm4, %v1248_v52, -inf }
 0xb1b   :  { %1254 = vmax.xlane.f32.xlu2 %v1253_v42 }
 0xb1e   :  { %v1134_v26 = vpop.xlane.xlu1 %1133 }
 0xb1f   :  { %v1136_v4 = vsub.f32 %v1126_v5, %v1134_v26  ;;  %v1250_v10 = vpop.f32.mrf.mxu3 }
 0xb20   :  { %v1251_v32 = vadd.f32 %v1250_v10, %v2961_v44 }
 0xb21   :  { %v1139_v7 = vmul.f32 1.442695, %v1136_v4 }
 0xb22   :  { %v1256_v34 = vsel %vm1128_vm4, %v1251_v32, -inf }
 0xb23   :  { %2277 = vpow2.f32 %v1139_v7 }
 0xb24   :  { %2279 = vpow2.f32 %v1137_v15 }
 0xb29   :  { %v2976_v8 = vpop.eup %2277 }
 0xb2a   :  { %v1371_v11 = vpop.f32.mrf.mxu1  ;;  %v1144_v12 = vsel %vm1128_vm4, %v2976_v8, 0.0  ;;  %v2280_v27 = vpop.eup %2279 }
 0xb2b   :  { %v1372_v56 = vadd.f32 %v1371_v11, %v2950_v23  ;;  %1145 = vadd.xlane.f32.xlu2 %v1144_v12  ;;  %v1141_v28 = vsel %vm1128_vm4, %v2280_v27, 0.0 }
 0xb2d   :  { %v1377_v14 = vsel %vm1128_vm4, %v1372_v56, -inf }
 0xb2e   :  { %1378 = vmax.xlane.f32.xlu1 %v1377_v14 }
 0xb31   :  { %v1495_v16 = vpop.f32.mrf.mxu3 }
 0xb32   :  { %v2983_v17 = vadd.f32 %v1495_v16, %v2950_v23  ;;  %v1374_v18 = vpop.f32.mrf.mxu1  ;;  %v2165_v23 = vpop.permute.xlu2 %2164 }
 0xb33   :  { %v2986_v47 = vadd.f32 %v1374_v18, %v2961_v44  ;;  %v2166_v42 = vunpack.i.l.bf16 %v2165_v23  ;;  %v2167_v7 = vunpack.i.h.bf16 %v2165_v23 }
 0xb34   :  { %v1501_v20 = vsel %vm1128_vm4, %v2983_v17, -inf }
 0xb35   :  { %1502 = vmax.xlane.f32.xlu2 %v1501_v20  ;;  %v1380_v22 = vsel %vm1128_vm4, %v2986_v47, -inf }
 0xb36   :  { %v2160_v21 = vpop.permute.xlu1 %2159  ;;  %1381 = vmax.xlane.f32.xlu0 %v1380_v22 }
 0xb37   :  { %v2161_v24 = vunpack.i.l.bf16 %v2160_v21  ;;  %v2162_v49 = vunpack.i.h.bf16 %v2160_v21 }
 0xb39   :  { %1313 = vmatpush.msra.mxu2 %v2161_v24  ;;  %v1498_v25 = vpop.f32.mrf.mxu3 }
 0xb3a   :  { %v1499_v31 = vadd.f32 %v1498_v25, %v2961_v44 }
 0xb3b   :  { %1314 = vmatpush.msra.mxu2 %v2162_v49 }
 0xb3c   :  { %v1504_v29 = vsel %vm1128_vm4, %v1499_v31, -inf }
 0xb3d   :  { %1505 = vmax.xlane.f32.xlu1 %v1504_v29 }
 0xb3e   :  { %1142 = vadd.xlane.f32.xlu0 %v1141_v28 }
 0xb46   :  { %1257 = vmax.xlane.f32.xlu0 %v1256_v34 }
 0xb4d   :  { %2174 = vrot.lane.b32.xlu2 %v2919_v33, %s2361_s15 }
 0xb55   :  { %2179 = vrot.lane.b32.xlu2 %v2926_v62, %s2360_s30 }
 0xb5d   :  { %2184 = vrot.lane.b32.xlu2 %v2887_v61, %s2361_s15 }
 0xb8e   :  { %v1255_v37 = vpop.xlane.xlu2 %1254 }
 0xb8f   :  { %v1259_v41 = vsub.f32 %v1248_v52, %v1255_v37 }
 0xb91   :  { %v1261_v44 = vmul.f32 1.442695, %v1259_v41 }
 0xb9e   :  { %v1146_v39 = vpop.xlane.xlu2 %1145 }
 0xba1   :  { %v1379_v1 = vpop.xlane.xlu1 %1378 }
 0xba2   :  { %v1383_v0 = vsub.f32 %v1372_v56, %v1379_v1 }
 0xba4   :  { %v1385_v30 = vmul.f32 1.442695, %v1383_v0 }
 0xba6   :  { %2281 = vpow2.f32 %v1385_v30 }
 0xba7   :  { %2283 = vpow2.f32 %v1261_v44 }
 0xba8   :  { %v1503_v45 = vpop.xlane.xlu2 %1502 }
 0xba9   :  { %v1382_v46 = vpop.xlane.xlu0 %1381  ;;  %v1507_v9 = vsub.f32 %v2983_v17, %v1503_v45 }
 0xbaa   :  { %v1384_v21 = vsub.f32 %v2986_v47, %v1382_v46 }
 0xbab   :  { %v1509_v56 = vmul.f32 1.442695, %v1507_v9 }
 0xbac   :  { %v3003_v5 = vpop.eup %2281 }
 0xbad   :  { %v1389_v33 = vsel %vm1128_vm4, %v3003_v5, 0.0  ;;  %v2284_v55 = vpop.eup %2283 }
 0xbae   :  { %1390 = vadd.xlane.f32.xlu0 %v1389_v33  ;;  %v1265_v59 = vsel %vm1128_vm4, %v2284_v55, 0.0 }
 0xbb0   :  { %v2175_v36 = vpop.permute.xlu2 %2174  ;;  %v1506_v50 = vpop.xlane.xlu1 %1505 }
 0xbb1   :  { %v2176_v51 = vunpack.i.l.bf16 %v2175_v36  ;;  %v1508_v53 = vsub.f32 %v1499_v31, %v1506_v50  ;;  %v1143_v54 = vpop.xlane.xlu0 %1142  ;;  %v2177_v35 = vunpack.i.h.bf16 %v2175_v36 }
 0xbb2   :  { %2285 = vrcp.f32 %v1143_v54 }
 0xbb3   :  { %v1511_v58 = vmul.f32 1.442695, %v1508_v53  ;;  %1557 = vmatpush.msra.mxu0 %v2176_v51 }
 0xbb5   :  { %2287 = vpow2.f32 %v1511_v58  ;;  %1558 = vmatpush.msra.mxu0 %v2177_v35 }
 0xbb6   :  { %1266 = vadd.xlane.f32.xlu0 %v1265_v59  ;;  %2289 = vrcp.f32 %v1146_v39 }
 0xbb8   :  { %v2286_v60 = vpop.eup %2285  ;;  %v2180_v43 = vpop.permute.xlu2 %2179 }
 0xbb9   :  { %v1149_v63 = vmul.f32 %v2286_v60, %v2280_v27  ;;  %v1258_v52 = vpop.xlane.xlu0 %1257  ;;  %v2181_v23 = vunpack.i.l.bf16 %v2180_v43  ;;  %v2182_v37 = vunpack.i.h.bf16 %v2180_v43 }
 0xbba   :  { %v1260_v26 = vsub.f32 %v1251_v32, %v1258_v52  ;;  %v1603_v52 = vld [vmem:[%s3197_s11 + $0x18] sm:$0xff] }
 0xbbb   :  { %v3008_v4 = vpop.eup %2287  ;;  %1996 = vmatmul.msk.f32.vlgmr.msrb.gmra.mxu2 %vm1128_vm4, %v1149_v63  ;;  %1625 = vmatpush.msra.mxu1 %v1603_v52 }
 0xbbc   :  { %v1263_v10 = vmul.f32 1.442695, %v1260_v26  ;;  %1433 = vmatpush.msrb.mxu2 %v2166_v42  ;;  %v1516_v11 = vsel %vm1128_vm4, %v3008_v4, 0.0  ;;  %v2290_v12 = vpop.eup %2289  ;;  %v1602_v42 = vld [vmem:[%s3197_s11 + $0x10] sm:$0xff]  ;;  %v1601_v26 = vld [vmem:[%s3197_s11 + $0x8] sm:$0xff] }
 0xbbd   :  { %1517 = vadd.xlane.f32.xlu2 %v1516_v11  ;;  %v1150_v15 = vmul.f32 %v2290_v12, %v2976_v8  ;;  %v1387_v8 = vmul.f32 1.442695, %v1384_v21  ;;  %1626 = vmatpush.msra.mxu1 %v1602_v42 }
 0xbbe   :  { %2291 = vpow2.f32 %v1263_v10  ;;  %1434 = vmatpush.msrb.mxu2 %v2167_v7 }
 0xbbf   :  { %2293 = vpow2.f32 %v1509_v56  ;;  %1627 = vmatpush.msra.mxu1 %v1601_v26 }
 0xbc0   :  { %v2185_v13 = vpop.permute.xlu2 %2184  ;;  %2295 = vpow2.f32 %v1387_v8 }
 0xbc1   :  { %v2186_v14 = vunpack.i.l.bf16 %v2185_v13  ;;  %v2187_v16 = vunpack.i.h.bf16 %v2185_v13 }
 0xbc3   :  { %1997 = vmatmul.msk.f32.gmra.mxu2 %vm1128_vm4, %v1150_v15  ;;  %1559 = vmatpush.msra.mxu0 %v2186_v14 }
 0xbc4   :  { %v2292_v18 = vpop.eup %2291 }
 0xbc5   :  { %1560 = vmatpush.msra.mxu0 %v2187_v16  ;;  %v1268_v17 = vsel %vm1128_vm4, %v2292_v18, 0.0  ;;  %v2294_v20 = vpop.eup %2293 }
 0xbc6   :  { %1269 = vadd.xlane.f32.xlu1 %v1268_v17  ;;  %v1513_v22 = vsel %vm1128_vm4, %v2294_v20, 0.0  ;;  %v2296_v24 = vpop.eup %2295 }
 0xbc7   :  { %v1392_v49 = vsel %vm1128_vm4, %v2296_v24, 0.0 }
 0xbca   :  { %2169 = vrot.lane.b32.xlu0 %v2887_v61, %s2360_s30 }
 0xbce   :  { %1514 = vadd.xlane.f32.xlu1 %v1513_v22 }
 0xbe7   :  { %2189 = vrot.lane.b32.xlu1 %v2926_v62, %s2361_s15 }
 0xbf4   :  { %1393 = vadd.xlane.f32.xlu0 %v1392_v49 }
 0xc21   :  { %v1391_v25 = vpop.xlane.xlu0 %1390 }
 0xc29   :  { %v1267_v27 = vpop.xlane.xlu0 %1266 }
 0xc2a   :  { %2297 = vrcp.f32 %v1267_v27 }
 0xc30   :  { %v2298_v31 = vpop.eup %2297  ;;  %v1518_v41 = vpop.xlane.xlu2 %1517 }
 0xc31   :  { %v1273_v29 = vmul.f32 %v2298_v31, %v2284_v55 }
 0xc33   :  { %2006 = vmatmul.msk.f32.vlgmr.msra.gmra.mxu2 %vm1128_vm4, %v1273_v29  ;;  %v991_v29 = vld [vmem:[%s3196_s10 + $0x38] sm:$0xff] }
 0xc39   :  { %v1270_v61 = vpop.xlane.xlu1 %1269 }
 0xc3a   :  { %2299 = vrcp.f32 %v1270_v61  ;;  %v2193_v61 = vpack.i.bf16 %v991_v29, %v2822_v2  ;;  %v2223_v29 = vld [vmem:[%s3199_s13 + $0x3] ss:$0 sm:$0xff] }
 0xc3b   :  { %2301 = vrcp.f32 %v1391_v25 }
 0xc3c   :  { %v2170_v28 = vpop.permute.xlu0 %2169 }
 0xc3d   :  { %v2171_v47 = vunpack.i.l.bf16 %v2170_v28  ;;  %v2172_v32 = vunpack.i.h.bf16 %v2170_v28 }
 0xc3e   :  { %v1192_v54 = vpop.f32.mrf.mxu2 }
 0xc3f   :  { %1435 = vmatpush.msrb.mxu2 %v2171_v47 }
 0xc40   :  { %v2300_v34 = vpop.eup %2299 }
 0xc41   :  { %1436 = vmatpush.msrb.mxu2 %v2172_v32  ;;  %v1274_v62 = vmul.f32 %v2300_v34, %v2292_v18  ;;  %v2302_v39 = vpop.eup %2301  ;;  %v1515_v0 = vpop.xlane.xlu1 %1514 }
 0xc42   :  { %v1397_v1 = vmul.f32 %v2302_v39, %v3003_v5  ;;  %2303 = vrcp.f32 %v1515_v0  ;;  %v989_v0 = vld [vmem:[%s3196_s10 + $0x18] sm:$0xff] }
 0xc43   :  { %2007 = vmatmul.msk.f32.gmra.mxu2 %vm1128_vm4, %v1274_v62  ;;  %2305 = vrcp.f32 %v1518_v41  ;;  %v2203_v41 = vpack.i.bf16 %v989_v0, %v2834_v3 }
 0xc44   :  { %1437 = vmatpush.msrb.mxu2 %v2181_v23  ;;  %v988_v23 = vld [vmem:[%s3196_s10 + $0x8] sm:$0xff] }
 0xc46   :  { %1438 = vmatpush.msrb.mxu2 %v2182_v37  ;;  %v1195_v55 = vpop.f32.mrf.mxu2  ;;  %v2208_v37 = vpack.i.bf16 %v988_v23, %v2829_v19  ;;  %v990_v19 = vld [vmem:[%s3196_s10 + $0x28] sm:$0xff]  ;;  %v1831_v23 = vld [vmem:[%s3198_s12 + $0x38] sm:$0xff]  ;;  %s2368_s10 = smov [#allocation2]  }
 0xc47   :  { %1847 = vmatpush.msra.mxu3 %v1831_v23 }
 0xc48   :  { %v2304_v44 = vpop.eup %2303 }
 0xc49   :  { %v1521_v33 = vmul.f32 %v2304_v44, %v2294_v20  ;;  %v2306_v36 = vpop.eup %2305  ;;  %v2220_v20 = vld [vmem:[%s3199_s13] ss:$0 sm:$0xff] }
 0xc4a   :  { %v1522_v50 = vmul.f32 %v2306_v36, %v3008_v4  ;;  %v1600_v4 = vld [vmem:[%s3197_s11] sm:$0xff]  ;;  %v1605_v22 = vadd.f32 %v2220_v20, %v2864_v48  ;;  %v1606_v49 = vadd.f32 %v2220_v20, %v2874_v57 }
 0xc4b   :  { %2016 = vmatmul.msk.f32.vlgmr.msrb.gmra.mxu2 %vm1128_vm4, %v1397_v1  ;;  %1628 = vmatpush.msra.mxu1 %v1600_v4 }
 0xc59   :  { %v2190_v30 = vpop.permute.xlu1 %2189 }
 0xc5a   :  { %v2191_v45 = vunpack.i.l.bf16 %v2190_v30  ;;  %v2192_v46 = vunpack.i.h.bf16 %v2190_v30  ;;  %v2198_v30 = vpack.i.bf16 %v990_v19, %v2817_v6 }
 0xc5c   :  { %1561 = vmatpush.msra.mxu0 %v2191_v45 }
 0xc5e   :  { %1562 = vmatpush.msra.mxu0 %v2192_v46 }
 0xc5f   :  { %2026 = vmatmul.msk.f32.vlgmr.msra.gmra.mxu0 %vm1128_vm4, %v1521_v33 }
 0xc67   :  { %2027 = vmatmul.msk.f32.gmra.mxu0 %vm1128_vm4, %v1522_v50  ;;  %v1394_v5 = vpop.xlane.xlu0 %1393 }
 0xc68   :  { %2307 = vrcp.f32 %v1394_v5 }
 0xc6e   :  { %v2308_v51 = vpop.eup %2307 }
 0xc6f   :  { %v1398_v53 = vmul.f32 %v2308_v51, %v2296_v24 }
 0xc71   :  { %2017 = vmatmul.msk.f32.gmra.mxu2 %vm1128_vm4, %v1398_v53 }
 0xcb6   :  { %v1316_v35 = vpop.f32.mrf.mxu2 }
 0xcb7   :  { %1572 = vrot.lane.b32.xlu1 %v1316_v35, %s2362_s0 }
 0xcc6   :  { %v1319_v58 = vpop.f32.mrf.mxu2 }
 0xcce   :  { %v1440_v59 = vpop.f32.mrf.mxu2 }
 0xccf   :  { %1580 = vrot.lane.b32.xlu1 %v1440_v59, %s2363_s16 }
 0xcd7   :  { %1574 = vrot.lane.b32.xlu1 %v1319_v58, %s2362_s0 }
 0xcdc   :  { %v1564_v60 = vpop.f32.mrf.mxu0 }
 0xcdd   :  { %1588 = vrot.lane.b32.xlu0 %v1564_v60, %s2364_s17 }
 0xce4   :  { %v1567_v43 = vpop.f32.mrf.mxu0 }
 0xce5   :  { %1590 = vrot.lane.b32.xlu1 %v1567_v43, %s2364_s17 }
 0xcf4   :  { %v1443_v63 = vpop.f32.mrf.mxu2 }
 0xcf5   :  { %1582 = vrot.lane.b32.xlu2 %v1443_v63, %s2363_s16 }
 0xd29   :  { %v1573_v7 = vpop.permute.xlu1 %1572 }
 0xd2a   :  { %v1594_v10 = vsel %vm194_vm2, %v1192_v54, %v1573_v7 }
 0xd41   :  { %v1581_v9 = vpop.permute.xlu1 %1580 }
 0xd42   :  { %v1596_v11 = vsel %vm54_vm0, %v1594_v10, %v1581_v9  ;;  %v2221_v9 = vld [vmem:[%s3199_s13 + $0x1] ss:$0 sm:$0xff] }
 0xd49   :  { %v1575_v12 = vpop.permute.xlu1 %1574 }
 0xd4a   :  { %v1595_v15 = vsel %vm194_vm2, %v1195_v55, %v1575_v12 }
 0xd4f   :  { %v1589_v56 = vpop.permute.xlu0 %1588  ;;  %v1583_v14 = vpop.permute.xlu2 %1582 }
 0xd50   :  { %v1598_v13 = vsel %vm657_vm3, %v1596_v11, %v1589_v56  ;;  %v1597_v16 = vsel %vm54_vm0, %v1595_v15, %v1583_v14 }
 0xd51   :  { %2028 = vmatmul.msk.f32.vlgmr.msra.gmra.mxu1 %vm105_vm1, %v1598_v13 }
 0xd57   :  { %v1591_v18 = vpop.permute.xlu1 %1590 }
 0xd58   :  { %v1599_v17 = vsel %vm657_vm3, %v1597_v16, %v1591_v18 }
 0xd59   :  { %2029 = vmatmul.msk.f32.gmra.mxu1 %vm105_vm1, %v1599_v17 }
 0xdce   :  { %v1630_v21 = vpop.f32.mrf.mxu1 }
 0xdcf   :  { %v1631_v8 = vadd.f32 %v1630_v21, %v1605_v22  ;;  %v2222_v21 = vld [vmem:[%s3199_s13 + $0x2] ss:$0 sm:$0xff] }
 0xdd1   :  { %v1636_v24 = vsel %vm105_vm1, %v1631_v8, 0.0 }
 0xdd2   :  { %1637 = vadd.xlane.f32.xlu1 %v1636_v24 }
 0xdd6   :  { %v1633_v25 = vpop.f32.mrf.mxu1 }
 0xdd7   :  { %v1634_v27 = vadd.f32 %v1633_v25, %v1606_v49 }
 0xdd9   :  { %v1639_v31 = vsel %vm105_vm1, %v1634_v27, 0.0 }
 0xdda   :  { %1640 = vadd.xlane.f32.xlu0 %v1639_v31 }
 0xdee   :  { %2194 = vrot.lane.b32.xlu0 %v2193_v61, %s2366_s21 }
 0xdf6   :  { %2209 = vrot.lane.b32.xlu0 %v2208_v37, %s2366_s21 }
 0xe45   :  { %v1638_v48 = vpop.xlane.xlu1 %1637 }
 0xe46   :  { %v1642_v28 = vmul.f32 %v1638_v48, %v2728_v40 }
 0xe48   :  { %v1644_v47 = vsub.f32 %v1631_v8, %v1642_v28 }
 0xe4a   :  { %v1646_v32 = vmul.f32 %v1644_v47, %v1644_v47 }
 0xe4c   :  { %v1648_v57 = vsel %vm105_vm1, %v1646_v32, 0.0 }
 0xe4d   :  { %1649 = vadd.xlane.f32.xlu2 %v1648_v57  ;;  %v1641_v34 = vpop.xlane.xlu0 %1640 }
 0xe4e   :  { %v1643_v62 = vmul.f32 %v1641_v34, %v2728_v40 }
 0xe50   :  { %v3077_v2 = vsub.f32 %v1634_v27, %v1643_v62 }
 0xe52   :  { %v1647_v39 = vmul.f32 %v3077_v2, %v3077_v2 }
 0xe54   :  { %v1651_v1 = vsel %vm105_vm1, %v1647_v39, 0.0 }
 0xe55   :  { %1652 = vadd.xlane.f32.xlu1 %v1651_v1  ;;  %v1829_v1 = vld [vmem:[%s3198_s12 + $0x28] sm:$0xff] }
 0xe60   :  { %v2195_v44 = vpop.permute.xlu0 %2194 }
 0xe61   :  { %v2197_v45 = vunpack.i.h.bf16 %v2195_v44  ;;  %v2196_v46 = vunpack.i.l.bf16 %v2195_v44 }
 0xe63   :  { %v1710_v36 = vsel %vm105_vm1, %v2196_v46, %v2197_v45  ;;  %v1827_v45 = vld [vmem:[%s3198_s12 + $0x18] sm:$0xff] }
 0xe64   :  { %1733 = vmatpush.msra.mxu2 %v1710_v36 }
 0xe65   :  { %2204 = vrot.lane.b32.xlu2 %v2203_v41, %s2366_s21  ;;  %v1828_v41 = vld [vmem:[%s3198_s12 + $0x20] sm:$0xff] }
 0xe68   :  { %v2210_v7 = vpop.permute.xlu0 %2209 }
 0xe69   :  { %v2212_v16 = vunpack.i.h.bf16 %v2210_v7  ;;  %v2211_v18 = vunpack.i.l.bf16 %v2210_v7 }
 0xe6b   :  { %v1707_v24 = vsel %vm105_vm1, %v2211_v18, %v2212_v16 }
 0xe6e   :  { %2199 = vrot.lane.b32.xlu1 %v2198_v30, %s2366_s21  ;;  %s1920_s21 = sshll.u32 %s2368_s10, 4  ;;  %s1921_s21 = int_to_ptr.vmem [resolvable:$true] %s1920_s21 }
 0xec0   :  { %v1650_v33 = vpop.xlane.xlu2 %1649 }
 0xec1   :  { %v1654_v50 = vmul.f32 %v1650_v33, %v2728_v40  ;;  %v1826_v33 = vld [vmem:[%s3198_s12 + $0x10] sm:$0xff] }
 0xec3   :  { %v1656_v3 = vadd.f32 1e-06, %v1654_v50 }
 0xec5   :  { %2309 = vrsqrt.f32 %v1656_v3  ;;  %vm1664_vm2 = vweird.f32 %v1656_v3 }
 0xec8   :  { %v1653_v5 = vpop.xlane.xlu1 %1652  ;;  %v2205_v4 = vpop.permute.xlu2 %2204 }
 0xec9   :  { %v1655_v51 = vmul.f32 %v1653_v5, %v2728_v40  ;;  %v2207_v11 = vunpack.i.h.bf16 %v2205_v4  ;;  %v2206_v12 = vunpack.i.l.bf16 %v2205_v4  ;;  %v1825_v5 = vld [vmem:[%s3198_s12 + $0x8] sm:$0xff] }
 0xecb   :  { %v2310_v53 = vpop.eup %2309  ;;  %v1657_v54 = vadd.f32 1e-06, %v1655_v51  ;;  %v1708_v22 = vsel %vm105_vm1, %v2206_v12, %v2207_v11  ;;  %v1824_v51 = vld [vmem:[%s3198_s12] sm:$0xff] }
 0xecc   :  { %v1659_v55 = vmul.f32 %v2310_v53, %v1656_v3  ;;  %vm1665_vm0 = vweird.f32 %v2310_v53 }
 0xecd   :  { %2311 = vrsqrt.f32 %v1657_v54  ;;  %vm1666_vm3 = vmor %vm1664_vm2, %vm1665_vm0  ;;  %vm1674_vm6 = vweird.f32 %v1657_v54 }
 0xece   :  { %v1660_v6 = vmul.f32 %v2310_v53, %v1659_v55 }
 0xed0   :  { %v1661_v35 = vmul.f32 0.5, %v1660_v6 }
 0xed2   :  { %v1662_v59 = vsub.f32 1.5, %v1661_v35 }
 0xed3   :  { %v2312_v58 = vpop.eup %2311 }
 0xed4   :  { %v1669_v60 = vmul.f32 %v2312_v58, %v1657_v54  ;;  %v1663_v63 = vmul.f32 %v2310_v53, %v1662_v59  ;;  %vm1675_vm5 = vweird.f32 %v2312_v58 }
 0xed5   :  { %vm1676_vm7 = vmor %vm1674_vm6, %vm1675_vm5 }
 0xed6   :  { %v1670_v43 = vmul.f32 %v2312_v58, %v1669_v60  ;;  %v1667_v42 = vsel %vm1666_vm3, %v2310_v53, %v1663_v63 }
 0xed7   :  { %v1678_v10 = vmul.f32 %v1667_v42, %v1644_v47 }
 0xed8   :  { %v1671_v52 = vmul.f32 0.5, %v1670_v43 }
 0xed9   :  { %v1681_v17 = vmul.f32 %v2221_v9, %v1678_v10 }
 0xeda   :  { %v1672_v26 = vsub.f32 1.5, %v1671_v52 }
 0xedb   :  { %v3105_v49 = vadd.f32 %v2222_v21, %v1681_v17 }
 0xedc   :  { %v1673_v56 = vmul.f32 %v2312_v58, %v1672_v26 }
 0xede   :  { %v1677_v8 = vsel %vm1676_vm7, %v2312_v58, %v1673_v56 }
 0xedf   :  { %v1679_v25 = vmul.f32 %v1677_v8, %v3077_v2  ;;  %v1830_v2 = vld [vmem:[%s3198_s12 + $0x30] sm:$0xff] }
 0xee0   :  { %v2200_v13 = vpop.permute.xlu1 %2199  ;;  %1848 = vmatpush.msra.mxu3 %v1830_v2 }
 0xee1   :  { %v2202_v14 = vunpack.i.h.bf16 %v2200_v13  ;;  %v2201_v15 = vunpack.i.l.bf16 %v2200_v13  ;;  %v1682_v27 = vmul.f32 %v2221_v9, %v1679_v25 }
 0xee2   :  { %1849 = vmatpush.msra.mxu3 %v1829_v1 }
 0xee3   :  { %v1709_v20 = vsel %vm105_vm1, %v2201_v15, %v2202_v14  ;;  %v3110_v31 = vadd.f32 %v2222_v21, %v1682_v27 }
 0xee4   :  { %1734 = vmatpush.msra.mxu2 %v1709_v20  ;;  %1850 = vmatpush.msra.mxu3 %v1828_v41 }
 0xee6   :  { %1735 = vmatpush.msra.mxu2 %v1708_v22  ;;  %1851 = vmatpush.msra.mxu3 %v1827_v45 }
 0xee8   :  { %1736 = vmatpush.msra.mxu2 %v1707_v24  ;;  %1852 = vmatpush.msra.mxu3 %v1826_v33 }
 0xee9   :  { %2030 = vmatmul.msk.f32.vlgmr.msra.gmra.mxu2 %vm105_vm1, %v3105_v49 }
 0xeea   :  { %1853 = vmatpush.msra.mxu3 %v1825_v5 }
 0xeec   :  { %1854 = vmatpush.msra.mxu3 %v1824_v51 }
 0xef1   :  { %2031 = vmatmul.msk.f32.gmra.mxu2 %vm105_vm1, %v3110_v31 }
 0xf6c   :  { %v1738_v61 = vpop.f32.mrf.mxu2 }
 0xf6d   :  { %v3117_v48 = vadd.f32 %v2223_v29, %v1738_v61 }
 0xf6f   :  { %v3120_v28 = vmul.f32 0.70710677, %v3117_v48 }
 0xf71   :  { %v1752_v47 = vand.u32 2147483647, %v3120_v28  ;;  %vm1748_vm0 = vcmp.ge.f32.partialorder %v3120_v28, 0.0 }
 0xf73   :  { %v1754_v32 = vmul.f32 0.3275911, %v1752_v47  ;;  %v1806_v58 = vsub.f32 0.0, %v1752_v47 }
 0xf74   :  { %v1741_v57 = vpop.f32.mrf.mxu2 }
 0xf75   :  { %v1756_v34 = vadd.f32 1.0, %v1754_v32  ;;  %v3123_v62 = vadd.f32 %v2223_v29, %v1741_v57  ;;  %v1808_v42 = vmul.f32 %v1806_v58, %v1752_v47 }
 0xf77   :  { %2313 = vrcp.f32 %v1756_v34  ;;  %v3129_v37 = vmul.f32 0.70710677, %v3123_v62  ;;  %v1769_v36 = vand.u32 2147483648, %v1756_v34  ;;  %v1767_v3 = vand.u32 2147483647, %v1756_v34 }
 0xf78   :  { %vm1763_vm10 = vweird.f32 %v1756_v34  ;;  %v1810_v12 = vmul.f32 1.442695, %v1808_v42  ;;  %v1745_v33 = vmul.f32 0.5, %v3123_v62 }
 0xf79   :  { %v1753_v39 = vand.u32 2147483647, %v3129_v37  ;;  %v1770_v54 = vor.u32 1.1754944e-38, %v1769_v36  ;;  %vm1768_vm12 = vcmp.eq.f32.partialorder %v1767_v3, 8.507059e+37  ;;  %vm1749_vm2 = vcmp.ge.f32.partialorder %v3129_v37, 0.0 }
 0xf7a   :  { %v1751_v45 = vsel %vm1749_vm2, 1.0, %v2367_v38 }
 0xf7b   :  { %v1755_v0 = vmul.f32 0.3275911, %v1753_v39  ;;  %v1807_v14 = vsub.f32 0.0, %v1753_v39 }
 0xf7d   :  { %v2314_v19 = vpop.eup %2313  ;;  %v1757_v44 = vadd.f32 1.0, %v1755_v0  ;;  %v1809_v22 = vmul.f32 %v1807_v14, %v1753_v39  ;;  %v1744_v39 = vmul.f32 0.5, %v3117_v48  ;;  %v2224_v48 = vld [vmem:[%s3199_s13 + $0x4] ss:$0 sm:$0xff] }
 0xf7e   :  { %v1759_v30 = vmul.f32 %v2314_v19, %v1756_v34  ;;  %vm1764_vm9 = vweird.f32 %v2314_v19  ;;  %v1750_v34 = vsel %vm1748_vm0, 1.0, %v2367_v38 }
 0xf7f   :  { %2315 = vrcp.f32 %v1757_v44  ;;  %vm1765_vm11 = vmor %vm1763_vm10, %vm1764_vm9  ;;  %v1784_v52 = vand.u32 2147483648, %v1757_v44  ;;  %v1782_v4 = vand.u32 2147483647, %v1757_v44  ;;  %vm1778_vm14 = vweird.f32 %v1757_v44 }
 0xf80   :  { %v1760_v46 = vsub.f32 1.0, %v1759_v30  ;;  %2317 = vpow2.f32 %v1810_v12  ;;  %v1812_v27 = vmul.f32 1.442695, %v1809_v22  ;;  %v2226_v22 = vld [vmem:[%s3199_s13 + $0x6] ss:$0 sm:$0xff] }
 0xf81   :  { %v1785_v11 = vor.u32 1.1754944e-38, %v1784_v52  ;;  %vm1783_vm4 = vcmp.eq.f32.partialorder %v1782_v4, 8.507059e+37 }
 0xf82   :  { %v1761_v50 = vmul.f32 %v2314_v19, %v1760_v46  ;;  %2319 = vpow2.f32 %v1812_v27 }
 0xf84   :  { %v1762_v53 = vadd.f32 %v2314_v19, %v1761_v50 }
 0xf85   :  { %v2316_v55 = vpop.eup %2315 }
 0xf86   :  { %v1766_v6 = vsel %vm1765_vm11, %v2314_v19, %v1762_v53  ;;  %v1774_v59 = vmul.f32 %v2316_v55, %v1757_v44  ;;  %vm1779_vm13 = vweird.f32 %v2316_v55  ;;  %v2318_v29 = vpop.eup %2317 }
 0xf87   :  { %v1771_v35 = vsel %vm1768_vm12, %v1770_v54, %v1766_v6  ;;  %vm1780_vm15 = vmor %vm1778_vm14, %vm1779_vm13 }
 0xf88   :  { %v1788_v60 = vmul.f32 1.0614054, %v1771_v35  ;;  %v1775_v43 = vsub.f32 1.0, %v1774_v59  ;;  %v2320_v19 = vpop.eup %2319 }
 0xf8a   :  { %v1790_v63 = vadd.f32 -1.4531521, %v1788_v60  ;;  %v1776_v26 = vmul.f32 %v2316_v55, %v1775_v43 }
 0xf8c   :  { %v1792_v7 = vmul.f32 %v1790_v63, %v1771_v35  ;;  %v1777_v9 = vadd.f32 %v2316_v55, %v1776_v26 }
 0xf8e   :  { %v1794_v10 = vadd.f32 1.4214138, %v1792_v7  ;;  %v1781_v56 = vsel %vm1780_vm15, %v2316_v55, %v1777_v9 }
 0xf8f   :  { %v1786_v15 = vsel %vm1783_vm4, %v1785_v11, %v1781_v56 }
 0xf90   :  { %v1796_v13 = vmul.f32 %v1794_v10, %v1771_v35  ;;  %v1789_v16 = vmul.f32 1.0614054, %v1786_v15 }
 0xf92   :  { %v1798_v18 = vadd.f32 -0.28449672, %v1796_v13  ;;  %v1791_v17 = vadd.f32 -1.4531521, %v1789_v16  ;;  %v2225_v16 = vld [vmem:[%s3199_s13 + $0x5] ss:$0 sm:$0xff] }
 0xf93   :  { %s2369_s13 = smov 128  }
 0xf94   :  { %v1800_v20 = vmul.f32 %v1798_v18, %v1771_v35  ;;  %v1793_v21 = vmul.f32 %v1791_v17, %v1786_v15 }
 0xf96   :  { %v1802_v8 = vadd.f32 0.2548296, %v1800_v20  ;;  %v1795_v24 = vadd.f32 1.4214138, %v1793_v21 }
 0xf98   :  { %v1804_v25 = vmul.f32 %v1802_v8, %v1771_v35  ;;  %v1797_v61 = vmul.f32 %v1795_v24, %v1786_v15 }
 0xf9a   :  { %v1814_v47 = vmul.f32 %v2318_v29, %v1804_v25  ;;  %v1799_v32 = vadd.f32 -0.28449672, %v1797_v61 }
 0xf9c   :  { %v1816_v57 = vsub.f32 1.0, %v1814_v47  ;;  %v1801_v23 = vmul.f32 %v1799_v32, %v1786_v15 }
 0xf9e   :  { %v1818_v2 = vmul.f32 %v1816_v57, %v1750_v34  ;;  %v1803_v1 = vadd.f32 0.2548296, %v1801_v23 }
 0xfa0   :  { %v1820_v0 = vadd.f32 1.0, %v1818_v2  ;;  %v1805_v41 = vmul.f32 %v1803_v1, %v1786_v15 }
 0xfa2   :  { %v1822_v30 = vmul.f32 %v1820_v0, %v1744_v39  ;;  %v1815_v44 = vmul.f32 %v2320_v19, %v1805_v41 }
 0xfa4   :  { %2032 = vmatmul.msk.f32.vlgmr.msra.gmra.mxu3 %vm900_vm8, %v1822_v30  ;;  %v1817_v28 = vsub.f32 1.0, %v1815_v44 }
 0xfa6   :  { %v1819_v46 = vmul.f32 %v1817_v28, %v1751_v45 }
 0xfa8   :  { %v1821_v36 = vadd.f32 1.0, %v1819_v46 }
 0xfaa   :  { %v1823_v50 = vmul.f32 %v1821_v36, %v1745_v33 }
 0xfac   :  { %2033 = vmatmul.msk.f32.gmra.mxu3 %vm900_vm8, %v1823_v50 }
0x1027   :  { %v1856_v3 = vpop.f32.mrf.mxu3 }
0x1028   :  { %v1857_v5 = vadd.f32 %v2224_v48, %v1856_v3 }
0x102a   :  { %v1862_v37 = vadd.f32 %v1857_v5, %v3105_v49 }
0x102c   :  { %v1864_v51 = vsel %vm105_vm1, %v1862_v37, 0.0 }
0x102d   :  { %1865 = vadd.xlane.f32.xlu0 %v1864_v51 }
0x102f   :  { %v1859_v53 = vpop.f32.mrf.mxu3 }
0x1030   :  { %v1860_v38 = vadd.f32 %v2224_v48, %v1859_v53 }
0x1032   :  { %v1863_v54 = vadd.f32 %v1860_v38, %v3110_v31 }
0x1034   :  { %v1867_v62 = vsel %vm105_vm1, %v1863_v54, 0.0 }
0x1035   :  { %1868 = vadd.xlane.f32.xlu1 %v1867_v62 }
0x10a0   :  { %v1866_v55 = vpop.xlane.xlu0 %1865 }
0x10a1   :  { %v1870_v6 = vmul.f32 %v1866_v55, %v2728_v40 }
0x10a3   :  { %v1872_v35 = vsub.f32 %v1862_v37, %v1870_v6 }
0x10a5   :  { %v1874_v58 = vmul.f32 %v1872_v35, %v1872_v35 }
0x10a7   :  { %v1876_v59 = vsel %vm105_vm1, %v1874_v58, 0.0 }
0x10a8   :  { %1877 = vadd.xlane.f32.xlu2 %v1876_v59  ;;  %v1869_v60 = vpop.xlane.xlu1 %1868 }
0x10a9   :  { %v1871_v49 = vmul.f32 %v1869_v60, %v2728_v40 }
0x10ab   :  { %v1873_v43 = vsub.f32 %v1863_v54, %v1871_v49 }
0x10ad   :  { %v1875_v63 = vmul.f32 %v1873_v43, %v1873_v43 }
0x10af   :  { %v1879_v52 = vsel %vm105_vm1, %v1875_v63, 0.0 }
0x10b0   :  { %1880 = vadd.xlane.f32.xlu0 %v1879_v52 }
0x111b   :  { %v1878_v31 = vpop.xlane.xlu2 %1877 }
0x111c   :  { %v1882_v42 = vmul.f32 %v1878_v31, %v2728_v40 }
0x111e   :  { %v1884_v26 = vadd.f32 1e-06, %v1882_v42 }
0x1120   :  { %2321 = vrsqrt.f32 %v1884_v26  ;;  %vm1892_vm3 = vweird.f32 %v1884_v26 }
0x1123   :  { %v1881_v4 = vpop.xlane.xlu0 %1880 }
0x1124   :  { %v1883_v7 = vmul.f32 %v1881_v4, %v2728_v40 }
0x1126   :  { %v2322_v9 = vpop.eup %2321  ;;  %v1885_v11 = vadd.f32 1e-06, %v1883_v7 }
0x1127   :  { %v1887_v10 = vmul.f32 %v2322_v9, %v1884_v26  ;;  %vm1893_vm8 = vweird.f32 %v2322_v9 }
0x1128   :  { %2323 = vrsqrt.f32 %v1885_v11  ;;  %vm1894_vm5 = vmor %vm1892_vm3, %vm1893_vm8  ;;  %vm1902_vm7 = vweird.f32 %v1885_v11 }
0x1129   :  { %v1888_v12 = vmul.f32 %v2322_v9, %v1887_v10 }
0x112b   :  { %v1889_v56 = vmul.f32 0.5, %v1888_v12 }
0x112d   :  { %v1890_v13 = vsub.f32 1.5, %v1889_v56 }
0x112e   :  { %v2324_v14 = vpop.eup %2323 }
0x112f   :  { %v1891_v15 = vmul.f32 %v2322_v9, %v1890_v13  ;;  %v1897_v18 = vmul.f32 %v2324_v14, %v1885_v11  ;;  %vm1903_vm6 = vweird.f32 %v2324_v14 }
0x1130   :  { %vm1904_vm9 = vmor %vm1902_vm7, %vm1903_vm6 }
0x1131   :  { %v1895_v17 = vsel %vm1894_vm5, %v2322_v9, %v1891_v15  ;;  %v1898_v40 = vmul.f32 %v2324_v14, %v1897_v18 }
0x1132   :  { %v1906_v20 = vmul.f32 %v1895_v17, %v1872_v35 }
0x1133   :  { %v1899_v8 = vmul.f32 0.5, %v1898_v40 }
0x1134   :  { %v1909_v21 = vmul.f32 %v2225_v16, %v1906_v20 }
0x1135   :  { %v1900_v24 = vsub.f32 1.5, %v1899_v8 }
0x1136   :  { %v1912_v25 = vadd.f32 %v2226_v22, %v1909_v21 }
0x1137   :  { %v1901_v27 = vmul.f32 %v2324_v14, %v1900_v24 }
0x1138   :  { %1914 = vst.msk [vmem:[#allocation2] sm:$0xff] %vm105_vm1, %v1912_v25 }
0x1139   :  { %v1905_v29 = vsel %vm1904_vm9, %v2324_v14, %v1901_v27 }
0x113a   :  { %v1907_v61 = vmul.f32 %v1905_v29, %v1873_v43 }
0x113c   :  { %v1910_v47 = vmul.f32 %v2225_v16, %v1907_v61 }
0x113e   :  { %v1913_v32 = vadd.f32 %v2226_v22, %v1910_v47 }
0x1140   :  { %1915 = vst.msk [vmem:[#allocation2 + $0x8] sm:$0xff] %vm105_vm1, %v1913_v32 }
0x1141   :  { %1928 = dma.vmem_to_hbm [thread:$0]  %s1921_s21, 256, %s1923_s22, [#allocation3], %s2369_s13, %s2369_s13, %s2362_s0  }
0x1142   :  { %2353 = dma.done.wait [#allocation3], 256  }
0x1143   :  { %2354 = vsyncadd [#allocation3], 4294967040 }
0x1144   :  { %1933 = vsyncpa [#allocation3], 1 }

</bundles_post_ra>
